<compile_context>
chip_gen: v7x
topology: tpu7x:2x2x1
jax: 0.10.0
libtpu: 0.0.40
codegen_flags: <defaults>
</compile_context>

<pallas_src>
import math

import jax
import jax.numpy as jnp
from jax.experimental import pallas as pl
from jax.experimental.pallas import tpu as pltpu

# ---------------- scaled-down synthetic config --------------------------------------
B, T = 2, 16          # batch, sequence length
VOCAB = 50            # synthetic vocab
D = 64                # BERT hidden size      (original 768)
NH, DH = 4, 16        # attention heads, head dim
FF = 128              # BERT intermediate size (original 3072)
NLAYERS = 2           # BERT encoder layers    (original 12)
NCLASSES = 13         # len(id2label)
LN_EPS = 1e-12
F32 = jnp.float32
BF16 = jnp.bfloat16


def _layer_norm(x, g, b):
    mu = jnp.mean(x, axis=-1, keepdims=True)
    xc = x - mu
    var = jnp.mean(xc * xc, axis=-1, keepdims=True)
    return (xc * jax.lax.rsqrt(var + LN_EPS)) * g + b


def _gelu(x):
    # TODO(synk): BERT uses exact erf-GELU; tanh approximation used here (EUP-friendly).
    return 0.5 * x * (1.0 + jnp.tanh(0.7978845608028654 * (x + 0.044715 * x * x * x)))


# --------------------------- fused per-sample forward-pass kernel -------------------
def _bert_kernel(x_ref, emb_g_ref, emb_b_ref,
                 wqkv_ref, bqkv_ref, wo_ref, bo_ref, ln1g_ref, ln1b_ref,
                 w1_ref, b1_ref, w2_ref, b2_ref, ln2g_ref, ln2b_ref,
                 poolw_ref, poolb_ref, clsw_ref, clsb_ref,
                 logits_ref,
                 ctx_scratch):
    scale = 1.0 / math.sqrt(DH)

    # ----- embeddings: LayerNorm(word + position + token_type), one sample per grid step -----
    h = _layer_norm(x_ref[0], emb_g_ref[...], emb_b_ref[...])               # (T, D), f32

    # ----- encoder layers (statically unrolled; all weights resident in VMEM) -----
    for l in range(NLAYERS):
        # fused Q|K|V projection: bf16 MXU inputs, f32 accumulation
        qkv = jnp.dot(h.astype(BF16), wqkv_ref[l],
                      preferred_element_type=F32) + bqkv_ref[l]              # (T, 3D)

        for hd in range(NH):                                                 # static head unroll
            q = qkv[:, hd * DH:(hd + 1) * DH] * scale                        # (T, DH)
            k = qkv[:, D + hd * DH: D + (hd + 1) * DH]
            v = qkv[:, 2 * D + hd * DH: 2 * D + (hd + 1) * DH]
            s = jax.lax.dot_general(q.astype(BF16), k.astype(BF16),
                                    (((1,), (1,)), ((), ())),
                                    preferred_element_type=F32)              # (T, T)
            m = jnp.max(s, axis=-1, keepdims=True)
            p = jnp.exp(s - m)                                               # unnormalized probs
            denom = jnp.sum(p, axis=-1, keepdims=True)                       # (T, 1)
            ctx = jnp.dot(p.astype(BF16), v.astype(BF16),
                          preferred_element_type=F32)                        # (T, DH)
            # deferred softmax normalization on the small ctx tile (EUP reciprocal, not VPU div)
            ctx_scratch[:, hd * DH:(hd + 1) * DH] = ctx * pl.reciprocal(denom, approx=True)

        # single K=D matmul merging all heads against W_o
        attn_out = jnp.dot(ctx_scratch[...].astype(BF16), wo_ref[l],
                           preferred_element_type=F32) + bo_ref[l]
        h = _layer_norm(attn_out + h, ln1g_ref[l], ln1b_ref[l])

        ff = _gelu(jnp.dot(h.astype(BF16), w1_ref[l],
                           preferred_element_type=F32) + b1_ref[l])
        ff = jnp.dot(ff.astype(BF16), w2_ref[l],
                     preferred_element_type=F32) + b2_ref[l]
        h = _layer_norm(ff + h, ln2g_ref[l], ln2b_ref[l])

    # ----- pooler (tanh dense on the [CLS] token = row 0 of this sample) + classifier -----
    cls = h[0:1, :]                                                          # (1, D) static slice
    pooled = jnp.tanh(jnp.dot(cls.astype(BF16), poolw_ref[...],
                              preferred_element_type=F32) + poolb_ref[...])
    logits = jnp.dot(pooled.astype(BF16), clsw_ref[...],
                     preferred_element_type=F32) + clsb_ref[...]             # (1, NCLASSES)
    logits_ref[0] = logits.astype(logits_ref.dtype)


def _resident_spec(shape):
    """Weight stays at the same block index for every grid step -> fetched once, stays in VMEM."""
    zero = (0,) * len(shape)
    return pl.BlockSpec(shape, lambda b, _zero=zero: _zero)


@jax.jit
def model_forward(params, input_ids):
    Bn, Tn = input_ids.shape
    # TODO(synk): embedding-table gather stays in JAX (no clean Pallas gather worth it here).
    x = (jnp.take(params["word_emb"], input_ids, axis=0)
         + params["pos_emb"][None, :Tn, :]
         + params["tok_emb"][0][None, None, :]).astype(F32)                  # (B, T, D), token_type==0

    # bf16 weight stacks (native MXU inputs, half the VMEM footprint); biases / LN params stay f32.
    wqkv = params["wqkv"].astype(BF16)
    wo = params["wo"].astype(BF16)
    w1 = params["w1"].astype(BF16)
    w2 = params["w2"].astype(BF16)
    pool_w = params["pool_w"].astype(BF16)
    cls_w = params["cls_w"].astype(BF16)

    operands = (
        x,
        params["emb_ln_g"], params["emb_ln_b"],
        wqkv, params["bqkv"], wo, params["bo"],
        params["ln1_g"], params["ln1_b"],
        w1, params["b1"], w2, params["b2"],
        params["ln2_g"], params["ln2_b"],
        pool_w, params["pool_b"], cls_w, params["cls_b"])

    in_specs = [pl.BlockSpec((1, Tn, D), lambda b: (b, 0, 0))]
    in_specs += [_resident_spec(op.shape) for op in operands[1:]]

    logits = pl.pallas_call(
        _bert_kernel,
        grid=(Bn,),
        in_specs=in_specs,
        out_specs=pl.BlockSpec((1, 1, NCLASSES), lambda b: (b, 0, 0)),
        out_shape=jax.ShapeDtypeStruct((Bn, 1, NCLASSES), F32),
        scratch_shapes=[pltpu.VMEM((Tn, D), F32)],
        compiler_params=pltpu.CompilerParams(
            dimension_semantics=("parallel",)),
    )(*operands)
    return logits.reshape(Bn, NCLASSES)


# ----------------------------- parameters --------------------------------------------
def init_params(key):
    keys = iter(jax.random.split(key, 64))
    nk = lambda: next(keys)
    w = lambda *shape: (0.02 * jax.random.normal(nk(), shape)).astype(F32)
    z = lambda *shape: jnp.zeros(shape, F32)
    ones = lambda *shape: jnp.ones(shape, F32)
    return {
        "word_emb": w(VOCAB, D),
        "pos_emb": w(T, D),
        "tok_emb": w(2, D),
        "emb_ln_g": ones(1, D), "emb_ln_b": z(1, D),
        # per-layer weights stacked on a leading axis so one fused kernel indexes them in VMEM
        "wqkv": w(NLAYERS, D, 3 * D), "bqkv": z(NLAYERS, 1, 3 * D),
        "wo": w(NLAYERS, D, D), "bo": z(NLAYERS, 1, D),
        "ln1_g": ones(NLAYERS, 1, D), "ln1_b": z(NLAYERS, 1, D),
        "w1": w(NLAYERS, D, FF), "b1": z(NLAYERS, 1, FF),
        "w2": w(NLAYERS, FF, D), "b2": z(NLAYERS, 1, D),
        "ln2_g": ones(NLAYERS, 1, D), "ln2_b": z(NLAYERS, 1, D),
        "pool_w": w(D, D), "pool_b": z(1, D),
        "cls_w": w(D, NCLASSES), "cls_b": z(1, NCLASSES),   # torch Linear W^T layout
    }


# ----------------------------- pure-JAX f32 reference ---------------------------------
def reference_forward(params, input_ids):
    Bn, Tn = input_ids.shape
    x = (jnp.take(params["word_emb"], input_ids, axis=0)
         + params["pos_emb"][None, :Tn, :] + params["tok_emb"][0][None, None, :])
    h = _layer_norm(x, params["emb_ln_g"], params["emb_ln_b"])
    for l in range(NLAYERS):
        qkv = h @ params["wqkv"][l] + params["bqkv"][l]
        q, k, v = jnp.split(qkv, 3, axis=-1)
        split = lambda t: t.reshape(Bn, Tn, NH, DH).transpose(0, 2, 1, 3)
        s = jnp.einsum("bhqd,bhkd->bhqk", split(q), split(k)) / math.sqrt(DH)
        p = jax.nn.softmax(s, axis=-1)
        ctx = jnp.einsum("bhqk,bhkd->bhqd", p, split(v)).transpose(0, 2, 1, 3).reshape(Bn, Tn, D)
        attn = ctx @ params["wo"][l] + params["bo"][l]
        h = _layer_norm(attn + h, params["ln1_g"][l], params["ln1_b"][l])
        ff = _gelu(h @ params["w1"][l] + params["b1"][l])
        ff = ff @ params["w2"][l] + params["b2"][l]
        h = _layer_norm(ff + h, params["ln2_g"][l], params["ln2_b"][l])
    pooled = jnp.tanh(h[:, 0, :] @ params["pool_w"] + params["pool_b"])
    return pooled @ params["cls_w"] + params["cls_b"]


if __name__ == "__main__":
    key = jax.random.PRNGKey(0)
    pkey, ikey = jax.random.split(key)
    params = init_params(pkey)
    input_ids = jax.random.randint(ikey, (B, T), 0, VOCAB, dtype=jnp.int32)

    logits = model_forward(params, input_ids)
    jax.block_until_ready(logits)
    assert logits.shape == (B, NCLASSES), logits.shape

    ref = reference_forward(params, input_ids)
    max_err = float(jnp.max(jnp.abs(logits - ref)))
    # bf16 MXU inputs vs. the f32 reference -> loosened tolerance (see performance review).
    assert jnp.allclose(logits, ref, atol=2e-2, rtol=2e-2), f"max_err={max_err}"
    print("KERNEL_OK")
</pallas_src>

<mosaic_0001>
module attributes {stable_mosaic.version = 11 : i64} {
  func.func @_bert_kernel(%arg0: i32, %arg1: memref<1x16x64xf32, #tpu.memory_space<vmem>>, %arg2: memref<1x64xf32, #tpu.memory_space<vmem>>, %arg3: memref<1x64xf32, #tpu.memory_space<vmem>>, %arg4: memref<2x64x192xbf16, #tpu.memory_space<vmem>>, %arg5: memref<2x1x192xf32, #tpu.memory_space<vmem>>, %arg6: memref<2x64x64xbf16, #tpu.memory_space<vmem>>, %arg7: memref<2x1x64xf32, #tpu.memory_space<vmem>>, %arg8: memref<2x1x64xf32, #tpu.memory_space<vmem>>, %arg9: memref<2x1x64xf32, #tpu.memory_space<vmem>>, %arg10: memref<2x64x128xbf16, #tpu.memory_space<vmem>>, %arg11: memref<2x1x128xf32, #tpu.memory_space<vmem>>, %arg12: memref<2x128x64xbf16, #tpu.memory_space<vmem>>, %arg13: memref<2x1x64xf32, #tpu.memory_space<vmem>>, %arg14: memref<2x1x64xf32, #tpu.memory_space<vmem>>, %arg15: memref<2x1x64xf32, #tpu.memory_space<vmem>>, %arg16: memref<64x64xbf16, #tpu.memory_space<vmem>>, %arg17: memref<1x64xf32, #tpu.memory_space<vmem>>, %arg18: memref<64x13xbf16, #tpu.memory_space<vmem>>, %arg19: memref<1x13xf32, #tpu.memory_space<vmem>>, %arg20: memref<1x1x13xf32, #tpu.memory_space<vmem>>, %arg21: memref<16x64xf32, #tpu.memory_space<vmem>>) attributes {dimension_semantics = [#tpu.dimension_semantics<parallel>], iteration_bounds = array<i64: 2>, scalar_prefetch = 0 : i64, scratch_operands = 1 : i64, tpu.core_type = #tpu.core_type<tc>, window_params = [{transform_indices = @transform_0, window_bounds = array<i64: 1, 16, 64>}, {pipeline_mode = #tpu.pipeline_mode<synchronous>, transform_indices = @transform_1, window_bounds = array<i64: 1, 64>}, {pipeline_mode = #tpu.pipeline_mode<synchronous>, transform_indices = @transform_2, window_bounds = array<i64: 1, 64>}, {pipeline_mode = #tpu.pipeline_mode<synchronous>, transform_indices = @transform_3, window_bounds = array<i64: 2, 64, 192>}, {pipeline_mode = #tpu.pipeline_mode<synchronous>, transform_indices = @transform_4, window_bounds = array<i64: 2, 1, 192>}, {pipeline_mode = #tpu.pipeline_mode<synchronous>, transform_indices = @transform_5, window_bounds = array<i64: 2, 64, 64>}, {pipeline_mode = #tpu.pipeline_mode<synchronous>, transform_indices = @transform_6, window_bounds = array<i64: 2, 1, 64>}, {pipeline_mode = #tpu.pipeline_mode<synchronous>, transform_indices = @transform_7, window_bounds = array<i64: 2, 1, 64>}, {pipeline_mode = #tpu.pipeline_mode<synchronous>, transform_indices = @transform_8, window_bounds = array<i64: 2, 1, 64>}, {pipeline_mode = #tpu.pipeline_mode<synchronous>, transform_indices = @transform_9, window_bounds = array<i64: 2, 64, 128>}, {pipeline_mode = #tpu.pipeline_mode<synchronous>, transform_indices = @transform_10, window_bounds = array<i64: 2, 1, 128>}, {pipeline_mode = #tpu.pipeline_mode<synchronous>, transform_indices = @transform_11, window_bounds = array<i64: 2, 128, 64>}, {pipeline_mode = #tpu.pipeline_mode<synchronous>, transform_indices = @transform_12, window_bounds = array<i64: 2, 1, 64>}, {pipeline_mode = #tpu.pipeline_mode<synchronous>, transform_indices = @transform_13, window_bounds = array<i64: 2, 1, 64>}, {pipeline_mode = #tpu.pipeline_mode<synchronous>, transform_indices = @transform_14, window_bounds = array<i64: 2, 1, 64>}, {pipeline_mode = #tpu.pipeline_mode<synchronous>, transform_indices = @transform_15, window_bounds = array<i64: 64, 64>}, {pipeline_mode = #tpu.pipeline_mode<synchronous>, transform_indices = @transform_16, window_bounds = array<i64: 1, 64>}, {pipeline_mode = #tpu.pipeline_mode<synchronous>, transform_indices = @transform_17, window_bounds = array<i64: 64, 13>}, {pipeline_mode = #tpu.pipeline_mode<synchronous>, transform_indices = @transform_18, window_bounds = array<i64: 1, 13>}, {transform_indices = @transform_19, window_bounds = array<i64: 1, 1, 13>}]} {
    %c0 = arith.constant 0 : index
    %c0_0 = arith.constant 0 : index
    %c0_1 = arith.constant 0 : index
    %0 = vector.load %arg1[%c0, %c0_0, %c0_1] : memref<1x16x64xf32, #tpu.memory_space<vmem>>, vector<1x16x64xf32>
    %1 = vector.shape_cast %0 : vector<1x16x64xf32> to vector<16x64xf32>
    %c0_2 = arith.constant 0 : index
    %c0_3 = arith.constant 0 : index
    %2 = vector.load %arg2[%c0_2, %c0_3] : memref<1x64xf32, #tpu.memory_space<vmem>>, vector<1x64xf32>
    %c0_4 = arith.constant 0 : index
    %c0_5 = arith.constant 0 : index
    %3 = vector.load %arg3[%c0_4, %c0_5] : memref<1x64xf32, #tpu.memory_space<vmem>>, vector<1x64xf32>
    %cst = arith.constant dense<0.000000e+00> : vector<16xf32>
    %4 = vector.multi_reduction <add>, %1, %cst [1] : vector<16x64xf32> to vector<16xf32>
    %5 = vector.shape_cast %4 : vector<16xf32> to vector<16x1xf32>
    %cst_6 = arith.constant 6.400000e+01 : f32
    %6 = vector.broadcast %cst_6 : f32 to vector<16x1xf32>
    %7 = arith.divf %5, %6 : vector<16x1xf32>
    %8 = vector.broadcast %7 : vector<16x1xf32> to vector<16x64xf32>
    %9 = arith.subf %1, %8 : vector<16x64xf32>
    %10 = arith.mulf %9, %9 : vector<16x64xf32>
    %cst_7 = arith.constant dense<0.000000e+00> : vector<16xf32>
    %11 = vector.multi_reduction <add>, %10, %cst_7 [1] : vector<16x64xf32> to vector<16xf32>
    %12 = vector.shape_cast %11 : vector<16xf32> to vector<16x1xf32>
    %cst_8 = arith.constant 6.400000e+01 : f32
    %13 = vector.broadcast %cst_8 : f32 to vector<16x1xf32>
    %14 = arith.divf %12, %13 : vector<16x1xf32>
    %cst_9 = arith.constant 9.99999996E-13 : f32
    %15 = vector.broadcast %cst_9 : f32 to vector<16x1xf32>
    %16 = arith.addf %14, %15 : vector<16x1xf32>
    %17 = math.rsqrt %16 : vector<16x1xf32>
    %18 = vector.broadcast %17 : vector<16x1xf32> to vector<16x64xf32>
    %19 = arith.mulf %9, %18 : vector<16x64xf32>
    %20 = vector.broadcast %2 : vector<1x64xf32> to vector<16x64xf32>
    %21 = arith.mulf %19, %20 : vector<16x64xf32>
    %22 = vector.broadcast %3 : vector<1x64xf32> to vector<16x64xf32>
    %23 = arith.addf %21, %22 : vector<16x64xf32>
    %24 = arith.truncf %23 : vector<16x64xf32> to vector<16x64xbf16>
    %c0_10 = arith.constant 0 : index
    %c0_11 = arith.constant 0 : index
    %c0_12 = arith.constant 0 : index
    %25 = vector.load %arg4[%c0_10, %c0_11, %c0_12] : memref<2x64x192xbf16, #tpu.memory_space<vmem>>, vector<1x64x192xbf16>
    %26 = vector.shape_cast %25 : vector<1x64x192xbf16> to vector<64x192xbf16>
    %cst_13 = arith.constant dense<0.000000e+00> : vector<16x192xf32>
    %27 = tpu.matmul %24, %26, %cst_13 {dimension_numbers = #tpu.dot_dimension_numbers<[1], [0], [0], [1], [0, 0, 1, 1], [], []>} : vector<16x64xbf16>, vector<64x192xbf16>, vector<16x192xf32> -> vector<16x192xf32>
    %c0_14 = arith.constant 0 : index
    %c0_15 = arith.constant 0 : index
    %c0_16 = arith.constant 0 : index
    %28 = vector.load %arg5[%c0_14, %c0_15, %c0_16] : memref<2x1x192xf32, #tpu.memory_space<vmem>>, vector<1x1x192xf32>
    %29 = vector.shape_cast %28 : vector<1x1x192xf32> to vector<1x192xf32>
    %30 = vector.broadcast %29 : vector<1x192xf32> to vector<16x192xf32>
    %31 = arith.addf %27, %30 : vector<16x192xf32>
    %32 = vector.extract_strided_slice %31 {offsets = [0, 0], sizes = [16, 16], strides = [1, 1]} : vector<16x192xf32> to vector<16x16xf32>
    %cst_17 = arith.constant 2.500000e-01 : f32
    %33 = vector.broadcast %cst_17 : f32 to vector<16x16xf32>
    %34 = arith.mulf %32, %33 : vector<16x16xf32>
    %35 = vector.extract_strided_slice %31 {offsets = [0, 64], sizes = [16, 16], strides = [1, 1]} : vector<16x192xf32> to vector<16x16xf32>
    %36 = vector.extract_strided_slice %31 {offsets = [0, 128], sizes = [16, 16], strides = [1, 1]} : vector<16x192xf32> to vector<16x16xf32>
    %37 = arith.truncf %34 : vector<16x16xf32> to vector<16x16xbf16>
    %38 = arith.truncf %35 : vector<16x16xf32> to vector<16x16xbf16>
    %cst_18 = arith.constant dense<0.000000e+00> : vector<16x16xf32>
    %39 = tpu.matmul %37, %38, %cst_18 {dimension_numbers = #tpu.dot_dimension_numbers<[1], [1], [0], [0], [0, 0, 1, 0], [], []>} : vector<16x16xbf16>, vector<16x16xbf16>, vector<16x16xf32> -> vector<16x16xf32>
    %cst_19 = arith.constant dense<0xFF800000> : vector<16xf32>
    %40 = vector.multi_reduction <maximumf>, %39, %cst_19 [1] : vector<16x16xf32> to vector<16xf32>
    %41 = vector.shape_cast %40 : vector<16xf32> to vector<16x1xf32>
    %42 = vector.broadcast %41 : vector<16x1xf32> to vector<16x16xf32>
    %43 = arith.subf %39, %42 : vector<16x16xf32>
    %44 = math.exp %43 : vector<16x16xf32>
    %cst_20 = arith.constant dense<0.000000e+00> : vector<16xf32>
    %45 = vector.multi_reduction <add>, %44, %cst_20 [1] : vector<16x16xf32> to vector<16xf32>
    %46 = vector.shape_cast %45 : vector<16xf32> to vector<16x1xf32>
    %47 = arith.truncf %44 : vector<16x16xf32> to vector<16x16xbf16>
    %48 = arith.truncf %36 : vector<16x16xf32> to vector<16x16xbf16>
    %cst_21 = arith.constant dense<0.000000e+00> : vector<16x16xf32>
    %49 = tpu.matmul %47, %48, %cst_21 {dimension_numbers = #tpu.dot_dimension_numbers<[1], [0], [0], [1], [0, 0, 1, 1], [], []>} : vector<16x16xbf16>, vector<16x16xbf16>, vector<16x16xf32> -> vector<16x16xf32>
    %50 = tpu.reciprocal %46 {approx = true} : vector<16x1xf32> -> vector<16x1xf32>
    %51 = vector.broadcast %50 : vector<16x1xf32> to vector<16x16xf32>
    %52 = arith.mulf %49, %51 : vector<16x16xf32>
    %c0_22 = arith.constant 0 : index
    %c0_23 = arith.constant 0 : index
    %53 = vector.load %arg21[%c0_22, %c0_23] : memref<16x64xf32, #tpu.memory_space<vmem>>, vector<16x16xf32>
    tpu.vector_store %arg21[%c0_22, %c0_23], %52 {strides = array<i32>} : memref<16x64xf32, #tpu.memory_space<vmem>>, vector<16x16xf32>,
    %54 = vector.extract_strided_slice %31 {offsets = [0, 16], sizes = [16, 16], strides = [1, 1]} : vector<16x192xf32> to vector<16x16xf32>
    %cst_24 = arith.constant 2.500000e-01 : f32
    %55 = vector.broadcast %cst_24 : f32 to vector<16x16xf32>
    %56 = arith.mulf %54, %55 : vector<16x16xf32>
    %57 = vector.extract_strided_slice %31 {offsets = [0, 80], sizes = [16, 16], strides = [1, 1]} : vector<16x192xf32> to vector<16x16xf32>
    %58 = vector.extract_strided_slice %31 {offsets = [0, 144], sizes = [16, 16], strides = [1, 1]} : vector<16x192xf32> to vector<16x16xf32>
    %59 = arith.truncf %56 : vector<16x16xf32> to vector<16x16xbf16>
    %60 = arith.truncf %57 : vector<16x16xf32> to vector<16x16xbf16>
    %cst_25 = arith.constant dense<0.000000e+00> : vector<16x16xf32>
    %61 = tpu.matmul %59, %60, %cst_25 {dimension_numbers = #tpu.dot_dimension_numbers<[1], [1], [0], [0], [0, 0, 1, 0], [], []>} : vector<16x16xbf16>, vector<16x16xbf16>, vector<16x16xf32> -> vector<16x16xf32>
    %cst_26 = arith.constant dense<0xFF800000> : vector<16xf32>
    %62 = vector.multi_reduction <maximumf>, %61, %cst_26 [1] : vector<16x16xf32> to vector<16xf32>
    %63 = vector.shape_cast %62 : vector<16xf32> to vector<16x1xf32>
    %64 = vector.broadcast %63 : vector<16x1xf32> to vector<16x16xf32>
    %65 = arith.subf %61, %64 : vector<16x16xf32>
    %66 = math.exp %65 : vector<16x16xf32>
    %cst_27 = arith.constant dense<0.000000e+00> : vector<16xf32>
    %67 = vector.multi_reduction <add>, %66, %cst_27 [1] : vector<16x16xf32> to vector<16xf32>
    %68 = vector.shape_cast %67 : vector<16xf32> to vector<16x1xf32>
    %69 = arith.truncf %66 : vector<16x16xf32> to vector<16x16xbf16>
    %70 = arith.truncf %58 : vector<16x16xf32> to vector<16x16xbf16>
    %cst_28 = arith.constant dense<0.000000e+00> : vector<16x16xf32>
    %71 = tpu.matmul %69, %70, %cst_28 {dimension_numbers = #tpu.dot_dimension_numbers<[1], [0], [0], [1], [0, 0, 1, 1], [], []>} : vector<16x16xbf16>, vector<16x16xbf16>, vector<16x16xf32> -> vector<16x16xf32>
    %72 = tpu.reciprocal %68 {approx = true} : vector<16x1xf32> -> vector<16x1xf32>
    %73 = vector.broadcast %72 : vector<16x1xf32> to vector<16x16xf32>
    %74 = arith.mulf %71, %73 : vector<16x16xf32>
    %c0_29 = arith.constant 0 : index
    %c16 = arith.constant 16 : index
    %75 = vector.load %arg21[%c0_29, %c16] : memref<16x64xf32, #tpu.memory_space<vmem>>, vector<16x16xf32>
    tpu.vector_store %arg21[%c0_29, %c16], %74 {strides = array<i32>} : memref<16x64xf32, #tpu.memory_space<vmem>>, vector<16x16xf32>,
    %76 = vector.extract_strided_slice %31 {offsets = [0, 32], sizes = [16, 16], strides = [1, 1]} : vector<16x192xf32> to vector<16x16xf32>
    %cst_30 = arith.constant 2.500000e-01 : f32
    %77 = vector.broadcast %cst_30 : f32 to vector<16x16xf32>
    %78 = arith.mulf %76, %77 : vector<16x16xf32>
    %79 = vector.extract_strided_slice %31 {offsets = [0, 96], sizes = [16, 16], strides = [1, 1]} : vector<16x192xf32> to vector<16x16xf32>
    %80 = vector.extract_strided_slice %31 {offsets = [0, 160], sizes = [16, 16], strides = [1, 1]} : vector<16x192xf32> to vector<16x16xf32>
    %81 = arith.truncf %78 : vector<16x16xf32> to vector<16x16xbf16>
    %82 = arith.truncf %79 : vector<16x16xf32> to vector<16x16xbf16>
    %cst_31 = arith.constant dense<0.000000e+00> : vector<16x16xf32>
    %83 = tpu.matmul %81, %82, %cst_31 {dimension_numbers = #tpu.dot_dimension_numbers<[1], [1], [0], [0], [0, 0, 1, 0], [], []>} : vector<16x16xbf16>, vector<16x16xbf16>, vector<16x16xf32> -> vector<16x16xf32>
    %cst_32 = arith.constant dense<0xFF800000> : vector<16xf32>
    %84 = vector.multi_reduction <maximumf>, %83, %cst_32 [1] : vector<16x16xf32> to vector<16xf32>
    %85 = vector.shape_cast %84 : vector<16xf32> to vector<16x1xf32>
    %86 = vector.broadcast %85 : vector<16x1xf32> to vector<16x16xf32>
    %87 = arith.subf %83, %86 : vector<16x16xf32>
    %88 = math.exp %87 : vector<16x16xf32>
    %cst_33 = arith.constant dense<0.000000e+00> : vector<16xf32>
    %89 = vector.multi_reduction <add>, %88, %cst_33 [1] : vector<16x16xf32> to vector<16xf32>
    %90 = vector.shape_cast %89 : vector<16xf32> to vector<16x1xf32>
    %91 = arith.truncf %88 : vector<16x16xf32> to vector<16x16xbf16>
    %92 = arith.truncf %80 : vector<16x16xf32> to vector<16x16xbf16>
    %cst_34 = arith.constant dense<0.000000e+00> : vector<16x16xf32>
    %93 = tpu.matmul %91, %92, %cst_34 {dimension_numbers = #tpu.dot_dimension_numbers<[1], [0], [0], [1], [0, 0, 1, 1], [], []>} : vector<16x16xbf16>, vector<16x16xbf16>, vector<16x16xf32> -> vector<16x16xf32>
    %94 = tpu.reciprocal %90 {approx = true} : vector<16x1xf32> -> vector<16x1xf32>
    %95 = vector.broadcast %94 : vector<16x1xf32> to vector<16x16xf32>
    %96 = arith.mulf %93, %95 : vector<16x16xf32>
    %c0_35 = arith.constant 0 : index
    %c32 = arith.constant 32 : index
    %97 = vector.load %arg21[%c0_35, %c32] : memref<16x64xf32, #tpu.memory_space<vmem>>, vector<16x16xf32>
    tpu.vector_store %arg21[%c0_35, %c32], %96 {strides = array<i32>} : memref<16x64xf32, #tpu.memory_space<vmem>>, vector<16x16xf32>,
    %98 = vector.extract_strided_slice %31 {offsets = [0, 48], sizes = [16, 16], strides = [1, 1]} : vector<16x192xf32> to vector<16x16xf32>
    %cst_36 = arith.constant 2.500000e-01 : f32
    %99 = vector.broadcast %cst_36 : f32 to vector<16x16xf32>
    %100 = arith.mulf %98, %99 : vector<16x16xf32>
    %101 = vector.extract_strided_slice %31 {offsets = [0, 112], sizes = [16, 16], strides = [1, 1]} : vector<16x192xf32> to vector<16x16xf32>
    %102 = vector.extract_strided_slice %31 {offsets = [0, 176], sizes = [16, 16], strides = [1, 1]} : vector<16x192xf32> to vector<16x16xf32>
    %103 = arith.truncf %100 : vector<16x16xf32> to vector<16x16xbf16>
    %104 = arith.truncf %101 : vector<16x16xf32> to vector<16x16xbf16>
    %cst_37 = arith.constant dense<0.000000e+00> : vector<16x16xf32>
    %105 = tpu.matmul %103, %104, %cst_37 {dimension_numbers = #tpu.dot_dimension_numbers<[1], [1], [0], [0], [0, 0, 1, 0], [], []>} : vector<16x16xbf16>, vector<16x16xbf16>, vector<16x16xf32> -> vector<16x16xf32>
    %cst_38 = arith.constant dense<0xFF800000> : vector<16xf32>
    %106 = vector.multi_reduction <maximumf>, %105, %cst_38 [1] : vector<16x16xf32> to vector<16xf32>
    %107 = vector.shape_cast %106 : vector<16xf32> to vector<16x1xf32>
    %108 = vector.broadcast %107 : vector<16x1xf32> to vector<16x16xf32>
    %109 = arith.subf %105, %108 : vector<16x16xf32>
    %110 = math.exp %109 : vector<16x16xf32>
    %cst_39 = arith.constant dense<0.000000e+00> : vector<16xf32>
    %111 = vector.multi_reduction <add>, %110, %cst_39 [1] : vector<16x16xf32> to vector<16xf32>
    %112 = vector.shape_cast %111 : vector<16xf32> to vector<16x1xf32>
    %113 = arith.truncf %110 : vector<16x16xf32> to vector<16x16xbf16>
    %114 = arith.truncf %102 : vector<16x16xf32> to vector<16x16xbf16>
    %cst_40 = arith.constant dense<0.000000e+00> : vector<16x16xf32>
    %115 = tpu.matmul %113, %114, %cst_40 {dimension_numbers = #tpu.dot_dimension_numbers<[1], [0], [0], [1], [0, 0, 1, 1], [], []>} : vector<16x16xbf16>, vector<16x16xbf16>, vector<16x16xf32> -> vector<16x16xf32>
    %116 = tpu.reciprocal %112 {approx = true} : vector<16x1xf32> -> vector<16x1xf32>
    %117 = vector.broadcast %116 : vector<16x1xf32> to vector<16x16xf32>
    %118 = arith.mulf %115, %117 : vector<16x16xf32>
    %c0_41 = arith.constant 0 : index
    %c48 = arith.constant 48 : index
    %119 = vector.load %arg21[%c0_41, %c48] : memref<16x64xf32, #tpu.memory_space<vmem>>, vector<16x16xf32>
    tpu.vector_store %arg21[%c0_41, %c48], %118 {strides = array<i32>} : memref<16x64xf32, #tpu.memory_space<vmem>>, vector<16x16xf32>,
    %c0_42 = arith.constant 0 : index
    %c0_43 = arith.constant 0 : index
    %120 = vector.load %arg21[%c0_42, %c0_43] : memref<16x64xf32, #tpu.memory_space<vmem>>, vector<16x64xf32>
    %121 = arith.truncf %120 : vector<16x64xf32> to vector<16x64xbf16>
    %c0_44 = arith.constant 0 : index
    %c0_45 = arith.constant 0 : index
    %c0_46 = arith.constant 0 : index
    %122 = vector.load %arg6[%c0_44, %c0_45, %c0_46] : memref<2x64x64xbf16, #tpu.memory_space<vmem>>, vector<1x64x64xbf16>
    %123 = vector.shape_cast %122 : vector<1x64x64xbf16> to vector<64x64xbf16>
    %cst_47 = arith.constant dense<0.000000e+00> : vector<16x64xf32>
    %124 = tpu.matmul %121, %123, %cst_47 {dimension_numbers = #tpu.dot_dimension_numbers<[1], [0], [0], [1], [0, 0, 1, 1], [], []>} : vector<16x64xbf16>, vector<64x64xbf16>, vector<16x64xf32> -> vector<16x64xf32>
    %c0_48 = arith.constant 0 : index
    %c0_49 = arith.constant 0 : index
    %c0_50 = arith.constant 0 : index
    %125 = vector.load %arg7[%c0_48, %c0_49, %c0_50] : memref<2x1x64xf32, #tpu.memory_space<vmem>>, vector<1x1x64xf32>
    %126 = vector.shape_cast %125 : vector<1x1x64xf32> to vector<1x64xf32>
    %127 = vector.broadcast %126 : vector<1x64xf32> to vector<16x64xf32>
    %128 = arith.addf %124, %127 : vector<16x64xf32>
    %129 = arith.addf %128, %23 : vector<16x64xf32>
    %c0_51 = arith.constant 0 : index
    %c0_52 = arith.constant 0 : index
    %c0_53 = arith.constant 0 : index
    %130 = vector.load %arg8[%c0_51, %c0_52, %c0_53] : memref<2x1x64xf32, #tpu.memory_space<vmem>>, vector<1x1x64xf32>
    %131 = vector.shape_cast %130 : vector<1x1x64xf32> to vector<1x64xf32>
    %c0_54 = arith.constant 0 : index
    %c0_55 = arith.constant 0 : index
    %c0_56 = arith.constant 0 : index
    %132 = vector.load %arg9[%c0_54, %c0_55, %c0_56] : memref<2x1x64xf32, #tpu.memory_space<vmem>>, vector<1x1x64xf32>
    %133 = vector.shape_cast %132 : vector<1x1x64xf32> to vector<1x64xf32>
    %cst_57 = arith.constant dense<0.000000e+00> : vector<16xf32>
    %134 = vector.multi_reduction <add>, %129, %cst_57 [1] : vector<16x64xf32> to vector<16xf32>
    %135 = vector.shape_cast %134 : vector<16xf32> to vector<16x1xf32>
    %cst_58 = arith.constant 6.400000e+01 : f32
    %136 = vector.broadcast %cst_58 : f32 to vector<16x1xf32>
    %137 = arith.divf %135, %136 : vector<16x1xf32>
    %138 = vector.broadcast %137 : vector<16x1xf32> to vector<16x64xf32>
    %139 = arith.subf %129, %138 : vector<16x64xf32>
    %140 = arith.mulf %139, %139 : vector<16x64xf32>
    %cst_59 = arith.constant dense<0.000000e+00> : vector<16xf32>
    %141 = vector.multi_reduction <add>, %140, %cst_59 [1] : vector<16x64xf32> to vector<16xf32>
    %142 = vector.shape_cast %141 : vector<16xf32> to vector<16x1xf32>
    %cst_60 = arith.constant 6.400000e+01 : f32
    %143 = vector.broadcast %cst_60 : f32 to vector<16x1xf32>
    %144 = arith.divf %142, %143 : vector<16x1xf32>
    %cst_61 = arith.constant 9.99999996E-13 : f32
    %145 = vector.broadcast %cst_61 : f32 to vector<16x1xf32>
    %146 = arith.addf %144, %145 : vector<16x1xf32>
    %147 = math.rsqrt %146 : vector<16x1xf32>
    %148 = vector.broadcast %147 : vector<16x1xf32> to vector<16x64xf32>
    %149 = arith.mulf %139, %148 : vector<16x64xf32>
    %150 = vector.broadcast %131 : vector<1x64xf32> to vector<16x64xf32>
    %151 = arith.mulf %149, %150 : vector<16x64xf32>
    %152 = vector.broadcast %133 : vector<1x64xf32> to vector<16x64xf32>
    %153 = arith.addf %151, %152 : vector<16x64xf32>
    %154 = arith.truncf %153 : vector<16x64xf32> to vector<16x64xbf16>
    %c0_62 = arith.constant 0 : index
    %c0_63 = arith.constant 0 : index
    %c0_64 = arith.constant 0 : index
    %155 = vector.load %arg10[%c0_62, %c0_63, %c0_64] : memref<2x64x128xbf16, #tpu.memory_space<vmem>>, vector<1x64x128xbf16>
    %156 = vector.shape_cast %155 : vector<1x64x128xbf16> to vector<64x128xbf16>
    %cst_65 = arith.constant dense<0.000000e+00> : vector<16x128xf32>
    %157 = tpu.matmul %154, %156, %cst_65 {dimension_numbers = #tpu.dot_dimension_numbers<[1], [0], [0], [1], [0, 0, 1, 1], [], []>} : vector<16x64xbf16>, vector<64x128xbf16>, vector<16x128xf32> -> vector<16x128xf32>
    %c0_66 = arith.constant 0 : index
    %c0_67 = arith.constant 0 : index
    %c0_68 = arith.constant 0 : index
    %158 = vector.load %arg11[%c0_66, %c0_67, %c0_68] : memref<2x1x128xf32, #tpu.memory_space<vmem>>, vector<1x1x128xf32>
    %159 = vector.shape_cast %158 : vector<1x1x128xf32> to vector<1x128xf32>
    %160 = vector.broadcast %159 : vector<1x128xf32> to vector<16x128xf32>
    %161 = arith.addf %157, %160 : vector<16x128xf32>
    %cst_69 = arith.constant 5.000000e-01 : f32
    %162 = vector.broadcast %cst_69 : f32 to vector<16x128xf32>
    %163 = arith.mulf %162, %161 : vector<16x128xf32>
    %cst_70 = arith.constant 4.471500e-02 : f32
    %164 = vector.broadcast %cst_70 : f32 to vector<16x128xf32>
    %165 = arith.mulf %164, %161 : vector<16x128xf32>
    %166 = arith.mulf %165, %161 : vector<16x128xf32>
    %167 = arith.mulf %166, %161 : vector<16x128xf32>
    %168 = arith.addf %161, %167 : vector<16x128xf32>
    %cst_71 = arith.constant 0.797884583 : f32
    %169 = vector.broadcast %cst_71 : f32 to vector<16x128xf32>
    %170 = arith.mulf %169, %168 : vector<16x128xf32>
    %171 = math.tanh %170 : vector<16x128xf32>
    %cst_72 = arith.constant 1.000000e+00 : f32
    %172 = vector.broadcast %cst_72 : f32 to vector<16x128xf32>
    %173 = arith.addf %172, %171 : vector<16x128xf32>
    %174 = arith.mulf %163, %173 : vector<16x128xf32>
    %175 = arith.truncf %174 : vector<16x128xf32> to vector<16x128xbf16>
    %c0_73 = arith.constant 0 : index
    %c0_74 = arith.constant 0 : index
    %c0_75 = arith.constant 0 : index
    %176 = vector.load %arg12[%c0_73, %c0_74, %c0_75] : memref<2x128x64xbf16, #tpu.memory_space<vmem>>, vector<1x128x64xbf16>
    %177 = vector.shape_cast %176 : vector<1x128x64xbf16> to vector<128x64xbf16>
    %cst_76 = arith.constant dense<0.000000e+00> : vector<16x64xf32>
    %178 = tpu.matmul %175, %177, %cst_76 {dimension_numbers = #tpu.dot_dimension_numbers<[1], [0], [0], [1], [0, 0, 1, 1], [], []>} : vector<16x128xbf16>, vector<128x64xbf16>, vector<16x64xf32> -> vector<16x64xf32>
    %c0_77 = arith.constant 0 : index
    %c0_78 = arith.constant 0 : index
    %c0_79 = arith.constant 0 : index
    %179 = vector.load %arg13[%c0_77, %c0_78, %c0_79] : memref<2x1x64xf32, #tpu.memory_space<vmem>>, vector<1x1x64xf32>
    %180 = vector.shape_cast %179 : vector<1x1x64xf32> to vector<1x64xf32>
    %181 = vector.broadcast %180 : vector<1x64xf32> to vector<16x64xf32>
    %182 = arith.addf %178, %181 : vector<16x64xf32>
    %183 = arith.addf %182, %153 : vector<16x64xf32>
    %c0_80 = arith.constant 0 : index
    %c0_81 = arith.constant 0 : index
    %c0_82 = arith.constant 0 : index
    %184 = vector.load %arg14[%c0_80, %c0_81, %c0_82] : memref<2x1x64xf32, #tpu.memory_space<vmem>>, vector<1x1x64xf32>
    %185 = vector.shape_cast %184 : vector<1x1x64xf32> to vector<1x64xf32>
    %c0_83 = arith.constant 0 : index
    %c0_84 = arith.constant 0 : index
    %c0_85 = arith.constant 0 : index
    %186 = vector.load %arg15[%c0_83, %c0_84, %c0_85] : memref<2x1x64xf32, #tpu.memory_space<vmem>>, vector<1x1x64xf32>
    %187 = vector.shape_cast %186 : vector<1x1x64xf32> to vector<1x64xf32>
    %cst_86 = arith.constant dense<0.000000e+00> : vector<16xf32>
    %188 = vector.multi_reduction <add>, %183, %cst_86 [1] : vector<16x64xf32> to vector<16xf32>
    %189 = vector.shape_cast %188 : vector<16xf32> to vector<16x1xf32>
    %cst_87 = arith.constant 6.400000e+01 : f32
    %190 = vector.broadcast %cst_87 : f32 to vector<16x1xf32>
    %191 = arith.divf %189, %190 : vector<16x1xf32>
    %192 = vector.broadcast %191 : vector<16x1xf32> to vector<16x64xf32>
    %193 = arith.subf %183, %192 : vector<16x64xf32>
    %194 = arith.mulf %193, %193 : vector<16x64xf32>
    %cst_88 = arith.constant dense<0.000000e+00> : vector<16xf32>
    %195 = vector.multi_reduction <add>, %194, %cst_88 [1] : vector<16x64xf32> to vector<16xf32>
    %196 = vector.shape_cast %195 : vector<16xf32> to vector<16x1xf32>
    %cst_89 = arith.constant 6.400000e+01 : f32
    %197 = vector.broadcast %cst_89 : f32 to vector<16x1xf32>
    %198 = arith.divf %196, %197 : vector<16x1xf32>
    %cst_90 = arith.constant 9.99999996E-13 : f32
    %199 = vector.broadcast %cst_90 : f32 to vector<16x1xf32>
    %200 = arith.addf %198, %199 : vector<16x1xf32>
    %201 = math.rsqrt %200 : vector<16x1xf32>
    %202 = vector.broadcast %201 : vector<16x1xf32> to vector<16x64xf32>
    %203 = arith.mulf %193, %202 : vector<16x64xf32>
    %204 = vector.broadcast %185 : vector<1x64xf32> to vector<16x64xf32>
    %205 = arith.mulf %203, %204 : vector<16x64xf32>
    %206 = vector.broadcast %187 : vector<1x64xf32> to vector<16x64xf32>
    %207 = arith.addf %205, %206 : vector<16x64xf32>
    %208 = arith.truncf %207 : vector<16x64xf32> to vector<16x64xbf16>
    %c1 = arith.constant 1 : index
    %c0_91 = arith.constant 0 : index
    %c0_92 = arith.constant 0 : index
    %209 = vector.load %arg4[%c1, %c0_91, %c0_92] : memref<2x64x192xbf16, #tpu.memory_space<vmem>>, vector<1x64x192xbf16>
    %210 = vector.shape_cast %209 : vector<1x64x192xbf16> to vector<64x192xbf16>
    %cst_93 = arith.constant dense<0.000000e+00> : vector<16x192xf32>
    %211 = tpu.matmul %208, %210, %cst_93 {dimension_numbers = #tpu.dot_dimension_numbers<[1], [0], [0], [1], [0, 0, 1, 1], [], []>} : vector<16x64xbf16>, vector<64x192xbf16>, vector<16x192xf32> -> vector<16x192xf32>
    %c1_94 = arith.constant 1 : index
    %c0_95 = arith.constant 0 : index
    %c0_96 = arith.constant 0 : index
    %212 = vector.load %arg5[%c1_94, %c0_95, %c0_96] : memref<2x1x192xf32, #tpu.memory_space<vmem>>, vector<1x1x192xf32>
    %213 = vector.shape_cast %212 : vector<1x1x192xf32> to vector<1x192xf32>
    %214 = vector.broadcast %213 : vector<1x192xf32> to vector<16x192xf32>
    %215 = arith.addf %211, %214 : vector<16x192xf32>
    %216 = vector.extract_strided_slice %215 {offsets = [0, 0], sizes = [16, 16], strides = [1, 1]} : vector<16x192xf32> to vector<16x16xf32>
    %cst_97 = arith.constant 2.500000e-01 : f32
    %217 = vector.broadcast %cst_97 : f32 to vector<16x16xf32>
    %218 = arith.mulf %216, %217 : vector<16x16xf32>
    %219 = vector.extract_strided_slice %215 {offsets = [0, 64], sizes = [16, 16], strides = [1, 1]} : vector<16x192xf32> to vector<16x16xf32>
    %220 = vector.extract_strided_slice %215 {offsets = [0, 128], sizes = [16, 16], strides = [1, 1]} : vector<16x192xf32> to vector<16x16xf32>
    %221 = arith.truncf %218 : vector<16x16xf32> to vector<16x16xbf16>
    %222 = arith.truncf %219 : vector<16x16xf32> to vector<16x16xbf16>
    %cst_98 = arith.constant dense<0.000000e+00> : vector<16x16xf32>
    %223 = tpu.matmul %221, %222, %cst_98 {dimension_numbers = #tpu.dot_dimension_numbers<[1], [1], [0], [0], [0, 0, 1, 0], [], []>} : vector<16x16xbf16>, vector<16x16xbf16>, vector<16x16xf32> -> vector<16x16xf32>
    %cst_99 = arith.constant dense<0xFF800000> : vector<16xf32>
    %224 = vector.multi_reduction <maximumf>, %223, %cst_99 [1] : vector<16x16xf32> to vector<16xf32>
    %225 = vector.shape_cast %224 : vector<16xf32> to vector<16x1xf32>
    %226 = vector.broadcast %225 : vector<16x1xf32> to vector<16x16xf32>
    %227 = arith.subf %223, %226 : vector<16x16xf32>
    %228 = math.exp %227 : vector<16x16xf32>
    %cst_100 = arith.constant dense<0.000000e+00> : vector<16xf32>
    %229 = vector.multi_reduction <add>, %228, %cst_100 [1] : vector<16x16xf32> to vector<16xf32>
    %230 = vector.shape_cast %229 : vector<16xf32> to vector<16x1xf32>
    %231 = arith.truncf %228 : vector<16x16xf32> to vector<16x16xbf16>
    %232 = arith.truncf %220 : vector<16x16xf32> to vector<16x16xbf16>
    %cst_101 = arith.constant dense<0.000000e+00> : vector<16x16xf32>
    %233 = tpu.matmul %231, %232, %cst_101 {dimension_numbers = #tpu.dot_dimension_numbers<[1], [0], [0], [1], [0, 0, 1, 1], [], []>} : vector<16x16xbf16>, vector<16x16xbf16>, vector<16x16xf32> -> vector<16x16xf32>
    %234 = tpu.reciprocal %230 {approx = true} : vector<16x1xf32> -> vector<16x1xf32>
    %235 = vector.broadcast %234 : vector<16x1xf32> to vector<16x16xf32>
    %236 = arith.mulf %233, %235 : vector<16x16xf32>
    %c0_102 = arith.constant 0 : index
    %c0_103 = arith.constant 0 : index
    %237 = vector.load %arg21[%c0_102, %c0_103] : memref<16x64xf32, #tpu.memory_space<vmem>>, vector<16x16xf32>
    tpu.vector_store %arg21[%c0_102, %c0_103], %236 {strides = array<i32>} : memref<16x64xf32, #tpu.memory_space<vmem>>, vector<16x16xf32>,
    %238 = vector.extract_strided_slice %215 {offsets = [0, 16], sizes = [16, 16], strides = [1, 1]} : vector<16x192xf32> to vector<16x16xf32>
    %cst_104 = arith.constant 2.500000e-01 : f32
    %239 = vector.broadcast %cst_104 : f32 to vector<16x16xf32>
    %240 = arith.mulf %238, %239 : vector<16x16xf32>
    %241 = vector.extract_strided_slice %215 {offsets = [0, 80], sizes = [16, 16], strides = [1, 1]} : vector<16x192xf32> to vector<16x16xf32>
    %242 = vector.extract_strided_slice %215 {offsets = [0, 144], sizes = [16, 16], strides = [1, 1]} : vector<16x192xf32> to vector<16x16xf32>
    %243 = arith.truncf %240 : vector<16x16xf32> to vector<16x16xbf16>
    %244 = arith.truncf %241 : vector<16x16xf32> to vector<16x16xbf16>
    %cst_105 = arith.constant dense<0.000000e+00> : vector<16x16xf32>
    %245 = tpu.matmul %243, %244, %cst_105 {dimension_numbers = #tpu.dot_dimension_numbers<[1], [1], [0], [0], [0, 0, 1, 0], [], []>} : vector<16x16xbf16>, vector<16x16xbf16>, vector<16x16xf32> -> vector<16x16xf32>
    %cst_106 = arith.constant dense<0xFF800000> : vector<16xf32>
    %246 = vector.multi_reduction <maximumf>, %245, %cst_106 [1] : vector<16x16xf32> to vector<16xf32>
    %247 = vector.shape_cast %246 : vector<16xf32> to vector<16x1xf32>
    %248 = vector.broadcast %247 : vector<16x1xf32> to vector<16x16xf32>
    %249 = arith.subf %245, %248 : vector<16x16xf32>
    %250 = math.exp %249 : vector<16x16xf32>
    %cst_107 = arith.constant dense<0.000000e+00> : vector<16xf32>
    %251 = vector.multi_reduction <add>, %250, %cst_107 [1] : vector<16x16xf32> to vector<16xf32>
    %252 = vector.shape_cast %251 : vector<16xf32> to vector<16x1xf32>
    %253 = arith.truncf %250 : vector<16x16xf32> to vector<16x16xbf16>
    %254 = arith.truncf %242 : vector<16x16xf32> to vector<16x16xbf16>
    %cst_108 = arith.constant dense<0.000000e+00> : vector<16x16xf32>
    %255 = tpu.matmul %253, %254, %cst_108 {dimension_numbers = #tpu.dot_dimension_numbers<[1], [0], [0], [1], [0, 0, 1, 1], [], []>} : vector<16x16xbf16>, vector<16x16xbf16>, vector<16x16xf32> -> vector<16x16xf32>
    %256 = tpu.reciprocal %252 {approx = true} : vector<16x1xf32> -> vector<16x1xf32>
    %257 = vector.broadcast %256 : vector<16x1xf32> to vector<16x16xf32>
    %258 = arith.mulf %255, %257 : vector<16x16xf32>
    %c0_109 = arith.constant 0 : index
    %c16_110 = arith.constant 16 : index
    %259 = vector.load %arg21[%c0_109, %c16_110] : memref<16x64xf32, #tpu.memory_space<vmem>>, vector<16x16xf32>
    tpu.vector_store %arg21[%c0_109, %c16_110], %258 {strides = array<i32>} : memref<16x64xf32, #tpu.memory_space<vmem>>, vector<16x16xf32>,
    %260 = vector.extract_strided_slice %215 {offsets = [0, 32], sizes = [16, 16], strides = [1, 1]} : vector<16x192xf32> to vector<16x16xf32>
    %cst_111 = arith.constant 2.500000e-01 : f32
    %261 = vector.broadcast %cst_111 : f32 to vector<16x16xf32>
    %262 = arith.mulf %260, %261 : vector<16x16xf32>
    %263 = vector.extract_strided_slice %215 {offsets = [0, 96], sizes = [16, 16], strides = [1, 1]} : vector<16x192xf32> to vector<16x16xf32>
    %264 = vector.extract_strided_slice %215 {offsets = [0, 160], sizes = [16, 16], strides = [1, 1]} : vector<16x192xf32> to vector<16x16xf32>
    %265 = arith.truncf %262 : vector<16x16xf32> to vector<16x16xbf16>
    %266 = arith.truncf %263 : vector<16x16xf32> to vector<16x16xbf16>
    %cst_112 = arith.constant dense<0.000000e+00> : vector<16x16xf32>
    %267 = tpu.matmul %265, %266, %cst_112 {dimension_numbers = #tpu.dot_dimension_numbers<[1], [1], [0], [0], [0, 0, 1, 0], [], []>} : vector<16x16xbf16>, vector<16x16xbf16>, vector<16x16xf32> -> vector<16x16xf32>
    %cst_113 = arith.constant dense<0xFF800000> : vector<16xf32>
    %268 = vector.multi_reduction <maximumf>, %267, %cst_113 [1] : vector<16x16xf32> to vector<16xf32>
    %269 = vector.shape_cast %268 : vector<16xf32> to vector<16x1xf32>
    %270 = vector.broadcast %269 : vector<16x1xf32> to vector<16x16xf32>
    %271 = arith.subf %267, %270 : vector<16x16xf32>
    %272 = math.exp %271 : vector<16x16xf32>
    %cst_114 = arith.constant dense<0.000000e+00> : vector<16xf32>
    %273 = vector.multi_reduction <add>, %272, %cst_114 [1] : vector<16x16xf32> to vector<16xf32>
    %274 = vector.shape_cast %273 : vector<16xf32> to vector<16x1xf32>
    %275 = arith.truncf %272 : vector<16x16xf32> to vector<16x16xbf16>
    %276 = arith.truncf %264 : vector<16x16xf32> to vector<16x16xbf16>
    %cst_115 = arith.constant dense<0.000000e+00> : vector<16x16xf32>
    %277 = tpu.matmul %275, %276, %cst_115 {dimension_numbers = #tpu.dot_dimension_numbers<[1], [0], [0], [1], [0, 0, 1, 1], [], []>} : vector<16x16xbf16>, vector<16x16xbf16>, vector<16x16xf32> -> vector<16x16xf32>
    %278 = tpu.reciprocal %274 {approx = true} : vector<16x1xf32> -> vector<16x1xf32>
    %279 = vector.broadcast %278 : vector<16x1xf32> to vector<16x16xf32>
    %280 = arith.mulf %277, %279 : vector<16x16xf32>
    %c0_116 = arith.constant 0 : index
    %c32_117 = arith.constant 32 : index
    %281 = vector.load %arg21[%c0_116, %c32_117] : memref<16x64xf32, #tpu.memory_space<vmem>>, vector<16x16xf32>
    tpu.vector_store %arg21[%c0_116, %c32_117], %280 {strides = array<i32>} : memref<16x64xf32, #tpu.memory_space<vmem>>, vector<16x16xf32>,
    %282 = vector.extract_strided_slice %215 {offsets = [0, 48], sizes = [16, 16], strides = [1, 1]} : vector<16x192xf32> to vector<16x16xf32>
    %cst_118 = arith.constant 2.500000e-01 : f32
    %283 = vector.broadcast %cst_118 : f32 to vector<16x16xf32>
    %284 = arith.mulf %282, %283 : vector<16x16xf32>
    %285 = vector.extract_strided_slice %215 {offsets = [0, 112], sizes = [16, 16], strides = [1, 1]} : vector<16x192xf32> to vector<16x16xf32>
    %286 = vector.extract_strided_slice %215 {offsets = [0, 176], sizes = [16, 16], strides = [1, 1]} : vector<16x192xf32> to vector<16x16xf32>
    %287 = arith.truncf %284 : vector<16x16xf32> to vector<16x16xbf16>
    %288 = arith.truncf %285 : vector<16x16xf32> to vector<16x16xbf16>
    %cst_119 = arith.constant dense<0.000000e+00> : vector<16x16xf32>
    %289 = tpu.matmul %287, %288, %cst_119 {dimension_numbers = #tpu.dot_dimension_numbers<[1], [1], [0], [0], [0, 0, 1, 0], [], []>} : vector<16x16xbf16>, vector<16x16xbf16>, vector<16x16xf32> -> vector<16x16xf32>
    %cst_120 = arith.constant dense<0xFF800000> : vector<16xf32>
    %290 = vector.multi_reduction <maximumf>, %289, %cst_120 [1] : vector<16x16xf32> to vector<16xf32>
    %291 = vector.shape_cast %290 : vector<16xf32> to vector<16x1xf32>
    %292 = vector.broadcast %291 : vector<16x1xf32> to vector<16x16xf32>
    %293 = arith.subf %289, %292 : vector<16x16xf32>
    %294 = math.exp %293 : vector<16x16xf32>
    %cst_121 = arith.constant dense<0.000000e+00> : vector<16xf32>
    %295 = vector.multi_reduction <add>, %294, %cst_121 [1] : vector<16x16xf32> to vector<16xf32>
    %296 = vector.shape_cast %295 : vector<16xf32> to vector<16x1xf32>
    %297 = arith.truncf %294 : vector<16x16xf32> to vector<16x16xbf16>
    %298 = arith.truncf %286 : vector<16x16xf32> to vector<16x16xbf16>
    %cst_122 = arith.constant dense<0.000000e+00> : vector<16x16xf32>
    %299 = tpu.matmul %297, %298, %cst_122 {dimension_numbers = #tpu.dot_dimension_numbers<[1], [0], [0], [1], [0, 0, 1, 1], [], []>} : vector<16x16xbf16>, vector<16x16xbf16>, vector<16x16xf32> -> vector<16x16xf32>
    %300 = tpu.reciprocal %296 {approx = true} : vector<16x1xf32> -> vector<16x1xf32>
    %301 = vector.broadcast %300 : vector<16x1xf32> to vector<16x16xf32>
    %302 = arith.mulf %299, %301 : vector<16x16xf32>
    %c0_123 = arith.constant 0 : index
    %c48_124 = arith.constant 48 : index
    %303 = vector.load %arg21[%c0_123, %c48_124] : memref<16x64xf32, #tpu.memory_space<vmem>>, vector<16x16xf32>
    tpu.vector_store %arg21[%c0_123, %c48_124], %302 {strides = array<i32>} : memref<16x64xf32, #tpu.memory_space<vmem>>, vector<16x16xf32>,
    %c0_125 = arith.constant 0 : index
    %c0_126 = arith.constant 0 : index
    %304 = vector.load %arg21[%c0_125, %c0_126] : memref<16x64xf32, #tpu.memory_space<vmem>>, vector<16x64xf32>
    %305 = arith.truncf %304 : vector<16x64xf32> to vector<16x64xbf16>
    %c1_127 = arith.constant 1 : index
    %c0_128 = arith.constant 0 : index
    %c0_129 = arith.constant 0 : index
    %306 = vector.load %arg6[%c1_127, %c0_128, %c0_129] : memref<2x64x64xbf16, #tpu.memory_space<vmem>>, vector<1x64x64xbf16>
    %307 = vector.shape_cast %306 : vector<1x64x64xbf16> to vector<64x64xbf16>
    %cst_130 = arith.constant dense<0.000000e+00> : vector<16x64xf32>
    %308 = tpu.matmul %305, %307, %cst_130 {dimension_numbers = #tpu.dot_dimension_numbers<[1], [0], [0], [1], [0, 0, 1, 1], [], []>} : vector<16x64xbf16>, vector<64x64xbf16>, vector<16x64xf32> -> vector<16x64xf32>
    %c1_131 = arith.constant 1 : index
    %c0_132 = arith.constant 0 : index
    %c0_133 = arith.constant 0 : index
    %309 = vector.load %arg7[%c1_131, %c0_132, %c0_133] : memref<2x1x64xf32, #tpu.memory_space<vmem>>, vector<1x1x64xf32>
    %310 = vector.shape_cast %309 : vector<1x1x64xf32> to vector<1x64xf32>
    %311 = vector.broadcast %310 : vector<1x64xf32> to vector<16x64xf32>
    %312 = arith.addf %308, %311 : vector<16x64xf32>
    %313 = arith.addf %312, %207 : vector<16x64xf32>
    %c1_134 = arith.constant 1 : index
    %c0_135 = arith.constant 0 : index
    %c0_136 = arith.constant 0 : index
    %314 = vector.load %arg8[%c1_134, %c0_135, %c0_136] : memref<2x1x64xf32, #tpu.memory_space<vmem>>, vector<1x1x64xf32>
    %315 = vector.shape_cast %314 : vector<1x1x64xf32> to vector<1x64xf32>
    %c1_137 = arith.constant 1 : index
    %c0_138 = arith.constant 0 : index
    %c0_139 = arith.constant 0 : index
    %316 = vector.load %arg9[%c1_137, %c0_138, %c0_139] : memref<2x1x64xf32, #tpu.memory_space<vmem>>, vector<1x1x64xf32>
    %317 = vector.shape_cast %316 : vector<1x1x64xf32> to vector<1x64xf32>
    %cst_140 = arith.constant dense<0.000000e+00> : vector<16xf32>
    %318 = vector.multi_reduction <add>, %313, %cst_140 [1] : vector<16x64xf32> to vector<16xf32>
    %319 = vector.shape_cast %318 : vector<16xf32> to vector<16x1xf32>
    %cst_141 = arith.constant 6.400000e+01 : f32
    %320 = vector.broadcast %cst_141 : f32 to vector<16x1xf32>
    %321 = arith.divf %319, %320 : vector<16x1xf32>
    %322 = vector.broadcast %321 : vector<16x1xf32> to vector<16x64xf32>
    %323 = arith.subf %313, %322 : vector<16x64xf32>
    %324 = arith.mulf %323, %323 : vector<16x64xf32>
    %cst_142 = arith.constant dense<0.000000e+00> : vector<16xf32>
    %325 = vector.multi_reduction <add>, %324, %cst_142 [1] : vector<16x64xf32> to vector<16xf32>
    %326 = vector.shape_cast %325 : vector<16xf32> to vector<16x1xf32>
    %cst_143 = arith.constant 6.400000e+01 : f32
    %327 = vector.broadcast %cst_143 : f32 to vector<16x1xf32>
    %328 = arith.divf %326, %327 : vector<16x1xf32>
    %cst_144 = arith.constant 9.99999996E-13 : f32
    %329 = vector.broadcast %cst_144 : f32 to vector<16x1xf32>
    %330 = arith.addf %328, %329 : vector<16x1xf32>
    %331 = math.rsqrt %330 : vector<16x1xf32>
    %332 = vector.broadcast %331 : vector<16x1xf32> to vector<16x64xf32>
    %333 = arith.mulf %323, %332 : vector<16x64xf32>
    %334 = vector.broadcast %315 : vector<1x64xf32> to vector<16x64xf32>
    %335 = arith.mulf %333, %334 : vector<16x64xf32>
    %336 = vector.broadcast %317 : vector<1x64xf32> to vector<16x64xf32>
    %337 = arith.addf %335, %336 : vector<16x64xf32>
    %338 = arith.truncf %337 : vector<16x64xf32> to vector<16x64xbf16>
    %c1_145 = arith.constant 1 : index
    %c0_146 = arith.constant 0 : index
    %c0_147 = arith.constant 0 : index
    %339 = vector.load %arg10[%c1_145, %c0_146, %c0_147] : memref<2x64x128xbf16, #tpu.memory_space<vmem>>, vector<1x64x128xbf16>
    %340 = vector.shape_cast %339 : vector<1x64x128xbf16> to vector<64x128xbf16>
    %cst_148 = arith.constant dense<0.000000e+00> : vector<16x128xf32>
    %341 = tpu.matmul %338, %340, %cst_148 {dimension_numbers = #tpu.dot_dimension_numbers<[1], [0], [0], [1], [0, 0, 1, 1], [], []>} : vector<16x64xbf16>, vector<64x128xbf16>, vector<16x128xf32> -> vector<16x128xf32>
    %c1_149 = arith.constant 1 : index
    %c0_150 = arith.constant 0 : index
    %c0_151 = arith.constant 0 : index
    %342 = vector.load %arg11[%c1_149, %c0_150, %c0_151] : memref<2x1x128xf32, #tpu.memory_space<vmem>>, vector<1x1x128xf32>
    %343 = vector.shape_cast %342 : vector<1x1x128xf32> to vector<1x128xf32>
    %344 = vector.broadcast %343 : vector<1x128xf32> to vector<16x128xf32>
    %345 = arith.addf %341, %344 : vector<16x128xf32>
    %cst_152 = arith.constant 5.000000e-01 : f32
    %346 = vector.broadcast %cst_152 : f32 to vector<16x128xf32>
    %347 = arith.mulf %346, %345 : vector<16x128xf32>
    %cst_153 = arith.constant 4.471500e-02 : f32
    %348 = vector.broadcast %cst_153 : f32 to vector<16x128xf32>
    %349 = arith.mulf %348, %345 : vector<16x128xf32>
    %350 = arith.mulf %349, %345 : vector<16x128xf32>
    %351 = arith.mulf %350, %345 : vector<16x128xf32>
    %352 = arith.addf %345, %351 : vector<16x128xf32>
    %cst_154 = arith.constant 0.797884583 : f32
    %353 = vector.broadcast %cst_154 : f32 to vector<16x128xf32>
    %354 = arith.mulf %353, %352 : vector<16x128xf32>
    %355 = math.tanh %354 : vector<16x128xf32>
    %cst_155 = arith.constant 1.000000e+00 : f32
    %356 = vector.broadcast %cst_155 : f32 to vector<16x128xf32>
    %357 = arith.addf %356, %355 : vector<16x128xf32>
    %358 = arith.mulf %347, %357 : vector<16x128xf32>
    %359 = arith.truncf %358 : vector<16x128xf32> to vector<16x128xbf16>
    %c1_156 = arith.constant 1 : index
    %c0_157 = arith.constant 0 : index
    %c0_158 = arith.constant 0 : index
    %360 = vector.load %arg12[%c1_156, %c0_157, %c0_158] : memref<2x128x64xbf16, #tpu.memory_space<vmem>>, vector<1x128x64xbf16>
    %361 = vector.shape_cast %360 : vector<1x128x64xbf16> to vector<128x64xbf16>
    %cst_159 = arith.constant dense<0.000000e+00> : vector<16x64xf32>
    %362 = tpu.matmul %359, %361, %cst_159 {dimension_numbers = #tpu.dot_dimension_numbers<[1], [0], [0], [1], [0, 0, 1, 1], [], []>} : vector<16x128xbf16>, vector<128x64xbf16>, vector<16x64xf32> -> vector<16x64xf32>
    %c1_160 = arith.constant 1 : index
    %c0_161 = arith.constant 0 : index
    %c0_162 = arith.constant 0 : index
    %363 = vector.load %arg13[%c1_160, %c0_161, %c0_162] : memref<2x1x64xf32, #tpu.memory_space<vmem>>, vector<1x1x64xf32>
    %364 = vector.shape_cast %363 : vector<1x1x64xf32> to vector<1x64xf32>
    %365 = vector.broadcast %364 : vector<1x64xf32> to vector<16x64xf32>
    %366 = arith.addf %362, %365 : vector<16x64xf32>
    %367 = arith.addf %366, %337 : vector<16x64xf32>
    %c1_163 = arith.constant 1 : index
    %c0_164 = arith.constant 0 : index
    %c0_165 = arith.constant 0 : index
    %368 = vector.load %arg14[%c1_163, %c0_164, %c0_165] : memref<2x1x64xf32, #tpu.memory_space<vmem>>, vector<1x1x64xf32>
    %369 = vector.shape_cast %368 : vector<1x1x64xf32> to vector<1x64xf32>
    %c1_166 = arith.constant 1 : index
    %c0_167 = arith.constant 0 : index
    %c0_168 = arith.constant 0 : index
    %370 = vector.load %arg15[%c1_166, %c0_167, %c0_168] : memref<2x1x64xf32, #tpu.memory_space<vmem>>, vector<1x1x64xf32>
    %371 = vector.shape_cast %370 : vector<1x1x64xf32> to vector<1x64xf32>
    %cst_169 = arith.constant dense<0.000000e+00> : vector<16xf32>
    %372 = vector.multi_reduction <add>, %367, %cst_169 [1] : vector<16x64xf32> to vector<16xf32>
    %373 = vector.shape_cast %372 : vector<16xf32> to vector<16x1xf32>
    %cst_170 = arith.constant 6.400000e+01 : f32
    %374 = vector.broadcast %cst_170 : f32 to vector<16x1xf32>
    %375 = arith.divf %373, %374 : vector<16x1xf32>
    %376 = vector.broadcast %375 : vector<16x1xf32> to vector<16x64xf32>
    %377 = arith.subf %367, %376 : vector<16x64xf32>
    %378 = arith.mulf %377, %377 : vector<16x64xf32>
    %cst_171 = arith.constant dense<0.000000e+00> : vector<16xf32>
    %379 = vector.multi_reduction <add>, %378, %cst_171 [1] : vector<16x64xf32> to vector<16xf32>
    %380 = vector.shape_cast %379 : vector<16xf32> to vector<16x1xf32>
    %cst_172 = arith.constant 6.400000e+01 : f32
    %381 = vector.broadcast %cst_172 : f32 to vector<16x1xf32>
    %382 = arith.divf %380, %381 : vector<16x1xf32>
    %cst_173 = arith.constant 9.99999996E-13 : f32
    %383 = vector.broadcast %cst_173 : f32 to vector<16x1xf32>
    %384 = arith.addf %382, %383 : vector<16x1xf32>
    %385 = math.rsqrt %384 : vector<16x1xf32>
    %386 = vector.broadcast %385 : vector<16x1xf32> to vector<16x64xf32>
    %387 = arith.mulf %377, %386 : vector<16x64xf32>
    %388 = vector.broadcast %369 : vector<1x64xf32> to vector<16x64xf32>
    %389 = arith.mulf %387, %388 : vector<16x64xf32>
    %390 = vector.broadcast %371 : vector<1x64xf32> to vector<16x64xf32>
    %391 = arith.addf %389, %390 : vector<16x64xf32>
    %392 = vector.extract_strided_slice %391 {offsets = [0, 0], sizes = [1, 64], strides = [1, 1]} : vector<16x64xf32> to vector<1x64xf32>
    %393 = arith.truncf %392 : vector<1x64xf32> to vector<1x64xbf16>
    %c0_174 = arith.constant 0 : index
    %c0_175 = arith.constant 0 : index
    %394 = vector.load %arg16[%c0_174, %c0_175] : memref<64x64xbf16, #tpu.memory_space<vmem>>, vector<64x64xbf16>
    %cst_176 = arith.constant dense<0.000000e+00> : vector<1x64xf32>
    %395 = tpu.matmul %393, %394, %cst_176 {dimension_numbers = #tpu.dot_dimension_numbers<[1], [0], [0], [1], [0, 0, 1, 1], [], []>} : vector<1x64xbf16>, vector<64x64xbf16>, vector<1x64xf32> -> vector<1x64xf32>
    %c0_177 = arith.constant 0 : index
    %c0_178 = arith.constant 0 : index
    %396 = vector.load %arg17[%c0_177, %c0_178] : memref<1x64xf32, #tpu.memory_space<vmem>>, vector<1x64xf32>
    %397 = arith.addf %395, %396 : vector<1x64xf32>
    %398 = math.tanh %397 : vector<1x64xf32>
    %399 = arith.truncf %398 : vector<1x64xf32> to vector<1x64xbf16>
    %c0_179 = arith.constant 0 : index
    %c0_180 = arith.constant 0 : index
    %400 = vector.load %arg18[%c0_179, %c0_180] : memref<64x13xbf16, #tpu.memory_space<vmem>>, vector<64x13xbf16>
    %cst_181 = arith.constant dense<0.000000e+00> : vector<1x13xf32>
    %401 = tpu.matmul %399, %400, %cst_181 {dimension_numbers = #tpu.dot_dimension_numbers<[1], [0], [0], [1], [0, 0, 1, 1], [], []>} : vector<1x64xbf16>, vector<64x13xbf16>, vector<1x13xf32> -> vector<1x13xf32>
    %c0_182 = arith.constant 0 : index
    %c0_183 = arith.constant 0 : index
    %402 = vector.load %arg19[%c0_182, %c0_183] : memref<1x13xf32, #tpu.memory_space<vmem>>, vector<1x13xf32>
    %403 = arith.addf %401, %402 : vector<1x13xf32>
    %c0_184 = arith.constant 0 : index
    %c0_185 = arith.constant 0 : index
    %c0_186 = arith.constant 0 : index
    %404 = vector.load %arg20[%c0_184, %c0_185, %c0_186] : memref<1x1x13xf32, #tpu.memory_space<vmem>>, vector<1x1x13xf32>
    %405 = vector.shape_cast %404 : vector<1x1x13xf32> to vector<1x13xf32>
    %406 = vector.shape_cast %403 : vector<1x13xf32> to vector<1x1x13xf32>
    tpu.vector_store %arg20[%c0_184, %c0_185, %c0_186], %406 {strides = array<i32>} : memref<1x1x13xf32, #tpu.memory_space<vmem>>, vector<1x1x13xf32>,
    return
  }
  func.func @transform_0(%arg0: i32) -> (i32, i32, i32) {
    %c0_i32 = arith.constant 0 : i32
    %c0_i32_0 = arith.constant 0 : i32
    %c0_i32_1 = arith.constant 0 : i32
    return %arg0, %c0_i32, %c0_i32_0 : i32, i32, i32
  }
  func.func @transform_1(%arg0: i32) -> (i32, i32) {
    %c0_i32 = arith.constant 0 : i32
    %c0_i32_0 = arith.constant 0 : i32
    %c0_i32_1 = arith.constant 0 : i32
    return %c0_i32, %c0_i32_0 : i32, i32
  }
  func.func @transform_2(%arg0: i32) -> (i32, i32) {
    %c0_i32 = arith.constant 0 : i32
    %c0_i32_0 = arith.constant 0 : i32
    %c0_i32_1 = arith.constant 0 : i32
    return %c0_i32, %c0_i32_0 : i32, i32
  }
  func.func @transform_3(%arg0: i32) -> (i32, i32, i32) {
    %c0_i32 = arith.constant 0 : i32
    %c0_i32_0 = arith.constant 0 : i32
    %c0_i32_1 = arith.constant 0 : i32
    %c0_i32_2 = arith.constant 0 : i32
    return %c0_i32, %c0_i32_0, %c0_i32_1 : i32, i32, i32
  }
  func.func @transform_4(%arg0: i32) -> (i32, i32, i32) {
    %c0_i32 = arith.constant 0 : i32
    %c0_i32_0 = arith.constant 0 : i32
    %c0_i32_1 = arith.constant 0 : i32
    %c0_i32_2 = arith.constant 0 : i32
    return %c0_i32, %c0_i32_0, %c0_i32_1 : i32, i32, i32
  }
  func.func @transform_5(%arg0: i32) -> (i32, i32, i32) {
    %c0_i32 = arith.constant 0 : i32
    %c0_i32_0 = arith.constant 0 : i32
    %c0_i32_1 = arith.constant 0 : i32
    %c0_i32_2 = arith.constant 0 : i32
    return %c0_i32, %c0_i32_0, %c0_i32_1 : i32, i32, i32
  }
  func.func @transform_6(%arg0: i32) -> (i32, i32, i32) {
    %c0_i32 = arith.constant 0 : i32
    %c0_i32_0 = arith.constant 0 : i32
    %c0_i32_1 = arith.constant 0 : i32
    %c0_i32_2 = arith.constant 0 : i32
    return %c0_i32, %c0_i32_0, %c0_i32_1 : i32, i32, i32
  }
  func.func @transform_7(%arg0: i32) -> (i32, i32, i32) {
    %c0_i32 = arith.constant 0 : i32
    %c0_i32_0 = arith.constant 0 : i32
    %c0_i32_1 = arith.constant 0 : i32
    %c0_i32_2 = arith.constant 0 : i32
    return %c0_i32, %c0_i32_0, %c0_i32_1 : i32, i32, i32
  }
  func.func @transform_8(%arg0: i32) -> (i32, i32, i32) {
    %c0_i32 = arith.constant 0 : i32
    %c0_i32_0 = arith.constant 0 : i32
    %c0_i32_1 = arith.constant 0 : i32
    %c0_i32_2 = arith.constant 0 : i32
    return %c0_i32, %c0_i32_0, %c0_i32_1 : i32, i32, i32
  }
  func.func @transform_9(%arg0: i32) -> (i32, i32, i32) {
    %c0_i32 = arith.constant 0 : i32
    %c0_i32_0 = arith.constant 0 : i32
    %c0_i32_1 = arith.constant 0 : i32
    %c0_i32_2 = arith.constant 0 : i32
    return %c0_i32, %c0_i32_0, %c0_i32_1 : i32, i32, i32
  }
  func.func @transform_10(%arg0: i32) -> (i32, i32, i32) {
    %c0_i32 = arith.constant 0 : i32
    %c0_i32_0 = arith.constant 0 : i32
    %c0_i32_1 = arith.constant 0 : i32
    %c0_i32_2 = arith.constant 0 : i32
    return %c0_i32, %c0_i32_0, %c0_i32_1 : i32, i32, i32
  }
  func.func @transform_11(%arg0: i32) -> (i32, i32, i32) {
    %c0_i32 = arith.constant 0 : i32
    %c0_i32_0 = arith.constant 0 : i32
    %c0_i32_1 = arith.constant 0 : i32
    %c0_i32_2 = arith.constant 0 : i32
    return %c0_i32, %c0_i32_0, %c0_i32_1 : i32, i32, i32
  }
  func.func @transform_12(%arg0: i32) -> (i32, i32, i32) {
    %c0_i32 = arith.constant 0 : i32
    %c0_i32_0 = arith.constant 0 : i32
    %c0_i32_1 = arith.constant 0 : i32
    %c0_i32_2 = arith.constant 0 : i32
    return %c0_i32, %c0_i32_0, %c0_i32_1 : i32, i32, i32
  }
  func.func @transform_13(%arg0: i32) -> (i32, i32, i32) {
    %c0_i32 = arith.constant 0 : i32
    %c0_i32_0 = arith.constant 0 : i32
    %c0_i32_1 = arith.constant 0 : i32
    %c0_i32_2 = arith.constant 0 : i32
    return %c0_i32, %c0_i32_0, %c0_i32_1 : i32, i32, i32
  }
  func.func @transform_14(%arg0: i32) -> (i32, i32, i32) {
    %c0_i32 = arith.constant 0 : i32
    %c0_i32_0 = arith.constant 0 : i32
    %c0_i32_1 = arith.constant 0 : i32
    %c0_i32_2 = arith.constant 0 : i32
    return %c0_i32, %c0_i32_0, %c0_i32_1 : i32, i32, i32
  }
  func.func @transform_15(%arg0: i32) -> (i32, i32) {
    %c0_i32 = arith.constant 0 : i32
    %c0_i32_0 = arith.constant 0 : i32
    %c0_i32_1 = arith.constant 0 : i32
    return %c0_i32, %c0_i32_0 : i32, i32
  }
  func.func @transform_16(%arg0: i32) -> (i32, i32) {
    %c0_i32 = arith.constant 0 : i32
    %c0_i32_0 = arith.constant 0 : i32
    %c0_i32_1 = arith.constant 0 : i32
    return %c0_i32, %c0_i32_0 : i32, i32
  }
  func.func @transform_17(%arg0: i32) -> (i32, i32) {
    %c0_i32 = arith.constant 0 : i32
    %c0_i32_0 = arith.constant 0 : i32
    %c0_i32_1 = arith.constant 0 : i32
    return %c0_i32, %c0_i32_0 : i32, i32
  }
  func.func @transform_18(%arg0: i32) -> (i32, i32) {
    %c0_i32 = arith.constant 0 : i32
    %c0_i32_0 = arith.constant 0 : i32
    %c0_i32_1 = arith.constant 0 : i32
    return %c0_i32, %c0_i32_0 : i32, i32
  }
  func.func @transform_19(%arg0: i32) -> (i32, i32, i32) {
    %c0_i32 = arith.constant 0 : i32
    %c0_i32_0 = arith.constant 0 : i32
    %c0_i32_1 = arith.constant 0 : i32
    return %arg0, %c0_i32, %c0_i32_0 : i32, i32, i32
  }
}

</mosaic_0001>

<bundles_post_ra>
// kernel: model_forward.1
= control target key start
LH: loop header
LB: loop body
LE: loop exit
PB: predicated region body
PF: predicated region fallthrough
CT: control target
= control target key end

     0   :  { %s4365_s0 = inlined_call_operand.vmem [shape: f32[2,16,64], index: 0, kind: input, shape index: {}]   ;;  %s4366_s1 = inlined_call_operand.vmem [shape: f32[1,64], index: 1, kind: input, shape index: {}]   ;;  %s4367_s2 = inlined_call_operand.vmem [shape: f32[1,64], index: 2, kind: input, shape index: {}]   ;;  %s4368_s3 = inlined_call_operand.vmem [shape: bf16[2,64,192], index: 3, kind: input, shape index: {}]   ;;  %s4369_s4 = inlined_call_operand.vmem [shape: f32[2,1,192], index: 4, kind: input, shape index: {}]   ;;  %s4370_s5 = inlined_call_operand.vmem [shape: bf16[2,64,64], index: 5, kind: input, shape index: {}]   ;;  %s4371_s6 = inlined_call_operand.vmem [shape: f32[2,1,64], index: 6, kind: input, shape index: {}]   ;;  %s4372_s7 = inlined_call_operand.vmem [shape: f32[2,1,64], index: 7, kind: input, shape index: {}]   ;;  %s4373_s8 = inlined_call_operand.vmem [shape: f32[2,1,64], index: 8, kind: input, shape index: {}]   ;;  %s4374_s9 = inlined_call_operand.vmem [shape: bf16[2,64,128], index: 9, kind: input, shape index: {}]   ;;  %s4375_s10 = inlined_call_operand.vmem [shape: f32[2,1,128], index: 10, kind: input, shape index: {}]   ;;  %s4376_s11 = inlined_call_operand.vmem [shape: bf16[2,128,64], index: 11, kind: input, shape index: {}]   ;;  %s4377_s12 = inlined_call_operand.vmem [shape: f32[2,1,64], index: 12, kind: input, shape index: {}]   ;;  %s4378_s13 = inlined_call_operand.vmem [shape: f32[2,1,64], index: 13, kind: input, shape index: {}]   ;;  %s4379_s14 = inlined_call_operand.vmem [shape: f32[2,1,64], index: 14, kind: input, shape index: {}]   ;;  %s4380_s15 = inlined_call_operand.vmem [shape: bf16[64,64], index: 15, kind: input, shape index: {}]   ;;  %s4381_s16 = inlined_call_operand.vmem [shape: f32[1,64], index: 16, kind: input, shape index: {}]   ;;  %s4382_s17 = inlined_call_operand.vmem [shape: bf16[64,13], index: 17, kind: input, shape index: {}]   ;;  %s4383_s18 = inlined_call_operand.vmem [shape: f32[1,13], index: 18, kind: input, shape index: {}]   ;;  %s4384_s19 = inlined_call_operand.hbm [shape: f32[2,1,13], index: 19, kind: output, shape index: {}]  }
   0x1   :  { %4404 = sst [smem:[#allocation11_spill]] %s4365_s0 }
   0x2   :  { %4405 = sst [smem:[#allocation12_spill]] %s4366_s1 }
   0x3   :  { %4406 = sst [smem:[#allocation13_spill]] %s4367_s2 }
   0x4   :  { %4407 = sst [smem:[#allocation14_spill]] %s4368_s3 }
   0x5   :  { %24 = vsyncpa [#allocation4], 0 }
   0x6   :  { %26 = vsyncpa [#allocation4 + $0x1], 0  ;;  %s3733_s0 = smov 0   ;;  %s3735_s30 = smov 0  }
   0x7   :  { %s3737_s20 = smov 0   ;;  %s3739_s21 = smov 0  }
   0x8 LB: > { %4408 = sst [smem:[#allocation6_spill]] %s3608_s0  ;;  %s3754_s1 = sadd.s32 4294967295, %s3620_s21   ;;  %s3620_s21 = sphi %s3739_s21, %s4428_s21   ;;  %s3616_s20 = sphi %s3737_s20, %s4430_s20   ;;  %s3612_s30 = sphi %s3735_s30, %s4432_s30   ;;  %s3608_s0 = sphi %s3733_s0, %s4431_s0  }
   0x9   : > { %4409 = sst [smem:[#allocation7_spill]] %s3616_s20  ;;  %s2911_s22 = sadd.s32 4294967294, %s3620_s21  }
   0xa   : > { %s3758_s2 = sadd.s32 1, %s3620_s21   ;;  %s443_s23 = sadd.s32 1, %s3616_s20 }
   0xb   : > { %4410 = sst [smem:[#allocation8_spill]] %s3758_s2  ;;  %s440_s24 = ssub.s32 %s3620_s21, %s3758_s2 }
   0xc   : > { %p453_p0 = scmp.ne.s32.totalorder %s3616_s20, %s3612_s30  ;;  %p441_p1 = scmp.eq.s32.totalorder %s440_s24, 0 }
   0xd   : > { %p454_p2 = scmp.eq.s32.totalorder %s3754_s1, 1  ;;  %p459_p3 = scmp.ne.s32.totalorder %s3612_s30, %s3608_s0 }
   0xe   : > { %p460_p4 = scmp.eq.s32.totalorder %s2911_s22, 1  ;;  %p2914_p7 = scmp.ge.s32.totalorder %s3620_s21, 1 }
   0xf   : > { %s3769_s25 = scalar_select %p441_p1, %s3616_s20, %s443_s23  }
  0x10   : > { %p3771_p5 = por %p454_p2, %p453_p0  ;;  %p3775_p6 = por %p460_p4, %p459_p3 }
  0x11   : > { %4411 = sst [smem:[#allocation9_spill]] %s3769_s25  ;;  %p540_p8 = scmp.lt.s32.totalorder %s3620_s21, 3 }
  0x12   : > { %s4413_s26 = scalar_select %p3775_p6, 1, 0 }
  0x13   : > { %p541_p9 = pnand %p2914_p7, %p540_p8 }
  0x14   : > { %4414 = sst [smem:[#allocation10_spill]] %s4413_s26  ;;  %p595_p10 = scmp.lt.s32.totalorder (!%p541_p9), %s3754_s1, 1  ;;  %vm605_vm0 = vcmask (!%p541_p9), 523264   ;;  %v3622_v22 = vmov (!%p541_p9), 0   ;;  %v660_v40 = vlaneseq (!%p541_p9)  ;;  %v658_v43 = vld [vmem:[%s4369_s4] sm:$0x3] (!%p541_p9) }
  0x15   : > { %544 = sbr.rel (%p541_p9) target bundleno = 5657 (0x1619), region = 96  ;;  %s4415_s23 = sld [smem:[#allocation11_spill]] (!%p541_p9)  ;;  %745 = vmatprep.mubr.bf16.mxu0 (!%p541_p9), %v3622_v22  ;;  %v3623_v44 = vmov (!%p541_p9), 0.0   ;;  %vm3624_vm1 = vmmov (!%p541_p9), 0   ;;  %vm763_vm2 = vcmask (!%p541_p9), 130048   ;;  %vm1012_vm3 = vcmask (!%p541_p9), 261248  }
  0x16   : > { %s4416_s29 = sld [smem:[#allocation14_spill]] (!%p541_p9)  ;;  %s4417_s2 = sld [smem:[#allocation12_spill]] (!%p541_p9)  ;;  %v3828_v41 = vshrl.u32 (!%p541_p9), %v660_v40, 7  ;;  %3145 = vmatprep.subr.bf16.mxu1 (!%p541_p9), %v3623_v44  ;;  %3147 = vmatprep.mubr.msk.bf16.mxu1 (!%p541_p9), %vm3624_vm1, %v3623_v44  ;;  %vm1144_vm4 = vcmask (!%p541_p9), 392448   ;;  %vm1276_vm5 = vcmask (!%p541_p9), 523648   ;;  %vm2841_vm6 = vcmask (!%p541_p9), 98304  }
  0x17   : > { %s4402_s25 = smov (!%p541_p9), 48   ;;  %s4399_s0 = smov (!%p541_p9), 96  }
  0x18   : > { %v662_v42 = vsub.s32 (!%p541_p9), 0, %v3828_v41  ;;  %v666_v45 = vsub.s32 (!%p541_p9), 1, %v3828_v41  ;;  %s4393_s20 = smov (!%p541_p9), 112   ;;  %s4397_s26 = smov (!%p541_p9), 32  }
  0x1a   : > { %v663_v46 = vrot.slane (!%p541_p9), %v658_v43, %v662_v42  ;;  %v667_v48 = vrot.slane (!%p541_p9), %v658_v43, %v666_v45 }
  0x1c   : > { %s596_s27 = scalar_select %p595_p10, %s3754_s1, 1  ;;  %v3402_v14 = vld [vmem:[%s4416_s29 + $0x4] ss:$8 sps:$4 sm:$0xff]   ;;  %v3404_v15 = vld [vmem:[%s4416_s29] ss:$8 sps:$4 sm:$0xff]  }
  0x1d   : > { %713 = vmatprep.subr.bf16.mxu0 %v3402_v14  ;;  %v3405_v16 = vld [vmem:[%s4416_s29 + $0x14] ss:$8 sps:$4 sm:$0xff]   ;;  %v3407_v17 = vld [vmem:[%s4416_s29 + $0x10] ss:$8 sps:$4 sm:$0xff]   ;;  %v3408_v18 = vld [vmem:[%s4416_s29 + $0x24] ss:$8 sps:$4 sm:$0xff]  }
  0x1e   : > { %s3064_s28 = sshll.u32 %s596_s27, 4  ;;  %714 = vmatpush1.bf16.msra.mxu0 %v3404_v15  ;;  %v3410_v19 = vld [vmem:[%s4416_s29 + $0x20] ss:$8 sps:$4 sm:$0xff]   ;;  %v3411_v20 = vld [vmem:[%s4416_s29 + $0x34] ss:$8 sps:$4 sm:$0xff]   ;;  %s4395_s27 = smov 16  }
  0x1f   : > { %s599_s24 = scalar_lea.vmem %s4415_s23, %s3064_s28  ;;  %715 = vmatprep.subr.bf16.mxu0 %v3405_v16  ;;  %v3413_v21 = vld [vmem:[%s4416_s29 + $0x30] ss:$8 sps:$4 sm:$0xff]   ;;  %v2917_v31 = vld [vmem:[%s4417_s2] ss:$0 sm:$0xff]  ;;  %s4418_s28 = sld [smem:[#allocation13_spill]] }
  0x20   : > { %v601_v0 = vld [vmem:[%s599_s24] sm:$0xff]  ;;  %v602_v1 = vld [vmem:[%s599_s24 + $0x8] sm:$0xff]  ;;  %s4401_s24 = smov 64   ;;  %s4391_s2 = smov 80  }
  0x21   : > { %v606_v2 = vsel %vm605_vm0, %v601_v0, 0.0  ;;  %v609_v3 = vsel %vm605_vm0, %v602_v1, 0.0 }
  0x22   : > { %607 = vadd.xlane.f32.xlu0 %v606_v2  ;;  %716 = vmatpush1.bf16.msra.mxu0 %v3407_v17 }
  0x23   : > { %717 = vmatprep.subr.bf16.mxu0 %v3408_v18 }
  0x25   : > { %v2918_v35 = vld [vmem:[%s4418_s28] ss:$0 sm:$0xff]  ;;  %s4422_s28 = smov 112  }
  0x26   : > { %610 = vadd.xlane.f32.xlu0 %v609_v3  ;;  %718 = vmatpush1.bf16.msra.mxu0 %v3410_v19 }
  0x27   : > { %719 = vmatprep.subr.bf16.mxu0 %v3411_v20 }
  0x2a   : > { %720 = vmatpush1.bf16.msra.mxu0 %v3413_v21 }
  0x2b   : > { %3157 = vmatprep.subr.bf16.mxu0 %v3623_v44 }
  0xaf   : > { %v608_v4 = vpop.xlane.xlu0 %607 }
  0xb0   : > { %v613_v5 = vmul.f32 0.015625, %v608_v4 }
  0xb2   : > { %v615_v6 = vsub.f32 %v601_v0, %v613_v5 }
  0xb3   : > { %v611_v7 = vpop.xlane.xlu0 %610 }
  0xb4   : > { %v614_v8 = vmul.f32 0.015625, %v611_v7  ;;  %v617_v9 = vmul.f32 %v615_v6, %v615_v6 }
  0xb6   : > { %v616_v10 = vsub.f32 %v602_v1, %v614_v8  ;;  %v619_v11 = vsel %vm605_vm0, %v617_v9, 0.0 }
  0xb7   : > { %620 = vadd.xlane.f32.xlu1 %v619_v11 }
  0xb8   : > { %v618_v12 = vmul.f32 %v616_v10, %v616_v10 }
  0xba   : > { %v622_v13 = vsel %vm605_vm0, %v618_v12, 0.0 }
  0xbb   : > { %623 = vadd.xlane.f32.xlu1 %v622_v13 }
 0x144   : > { %v621_v23 = vpop.xlane.xlu1 %620 }
 0x145   : > { %v625_v24 = vmul.f32 0.015625, %v621_v23 }
 0x147   : > { %v627_v25 = vadd.f32 1e-12, %v625_v24 }
 0x148   : > { %v624_v26 = vpop.xlane.xlu1 %623 }
 0x149   : > { %3466 = vrsqrt.f32 %v627_v25  ;;  %v626_v27 = vmul.f32 0.015625, %v624_v26 }
 0x14b   : > { %v628_v28 = vadd.f32 1e-12, %v626_v27 }
 0x14d   : > { %3468 = vrsqrt.f32 %v628_v28 }
 0x153   : > { %v3467_v29 = vpop.eup %3466 }
 0x154   : > { %v631_v30 = vmul.f32 %v3467_v29, %v615_v6 }
 0x156   : > { %v639_v34 = vmul.f32 %v2917_v31, %v631_v30 }
 0x157   : > { %v3469_v32 = vpop.eup %3468 }
 0x158   : > { %v632_v33 = vmul.f32 %v3469_v32, %v616_v10  ;;  %v3821_v37 = vadd.f32 %v2918_v35, %v639_v34 }
 0x15a   : > { %v640_v36 = vmul.f32 %v2917_v31, %v632_v33 }
 0x15c   : > { %v3823_v38 = vadd.f32 %v2918_v35, %v640_v36 }
 0x15e   : > { %v649_v39 = vpack.c.bf16 %v3823_v38, %v3821_v37 }
 0x160   : > { %2927 = vmatmul.mubr.msk.bf16.vlgmr.msra.gmra.mrb[0].mxu0 %vm605_vm0, %v649_v39 }
 0x161   : > { %3159 = vmatprep.mubr.msk.bf16.mxu0 %vm3624_vm1, %v3623_v44 }
 0x233   : > { %v747_v47 = vpop.f32.mrb[0].mxu0 }
 0x234   : > { %v748_v49 = vadd.f32 %v747_v47, %v663_v46  ;;  %v749_v50 = vpop.f32.mrb[1].mxu0 }
 0x235   : > { %v751_v51 = vpop.f32.mrb[2].mxu0  ;;  %v750_v54 = vadd.f32 %v749_v50, %v667_v48 }
 0x236   : > { %v752_v52 = vadd.f32 %v751_v51, %v663_v46  ;;  %v753_v53 = vpop.f32.mrb[3].mxu0  ;;  %v756_v56 = vmul.f32 0.25, %v748_v49 }
 0x237   : > { %v754_v55 = vadd.f32 %v753_v53, %v667_v48 }
 0x238   : > { %v757_v57 = vmul.f32 0.25, %v752_v52  ;;  %v759_v58 = vpack.c.bf16 %v752_v52, %v748_v49 }
 0x239   : > { %v3845_v59 = vpack.c.bf16 %v754_v55, %v750_v54 }
 0x23a   : > { %v758_v60 = vpack.c.bf16 %v757_v57, %v756_v56  ;;  %884 = vrot.lane.b32.xlu1 %v759_v58, %s4402_s25  ;;  %761 = vrot.lane.b32.xlu0 %v759_v58, %s4401_s24  ;;  %s4424_s24 = smov 32  }
 0x23e   : > { %1015 = vrot.lane.b32.xlu0 %v758_v60, %s4399_s0  ;;  %882 = vrot.lane.b32.xlu1 %v758_v60, %s4393_s20 }
 0x242   : > { %1147 = vrot.lane.b32.xlu0 %v758_v60, %s4391_s2  ;;  %1017 = vrot.lane.b32.xlu1 %v759_v58, %s4397_s26 }
 0x246   : > { %1149 = vrot.lane.b32.xlu1 %v759_v58, %s4395_s27 }
 0x2ac   : > { %v885_v61 = vpop.permute.xlu1 %884  ;;  %v762_v62 = vpop.permute.xlu0 %761 }
 0x2ad   : > { %v890_v63 = vsel %vm763_vm2, %v885_v61, 0  ;;  %v768_v0 = vsel %vm763_vm2, %v762_v62, 0 }
 0x2ae   : > { %3146 = vmatpush3.bf16.xpose.msra.mxu1 %v768_v0  ;;  %3158 = vmatpush3.bf16.xpose.msra.mxu0 %v890_v63 }
 0x2af   : > { %3151 = vmatprep.subr.bf16.mxu1 %v3623_v44  ;;  %3169 = vmatprep.subr.bf16.mxu0 %v3623_v44 }
 0x2b0   : > { %v883_v1 = vpop.permute.xlu1 %882  ;;  %v1016_v5 = vpop.permute.xlu0 %1015 }
 0x2b4   : > { %v1018_v2 = vpop.permute.xlu1 %1017  ;;  %v1148_v7 = vpop.permute.xlu0 %1147 }
 0x2b5   : > { %v1023_v3 = vsel %vm763_vm2, %v1018_v2, 0  ;;  %3148 = vmatmul.mubr.msk.bf16.vlgmr.msra.gmra.mrb[0].mxu1 %vm763_vm2, %v758_v60  ;;  %3160 = vmatmul.mubr.msk.bf16.vlgmr.msra.gmra.mrb[4].mxu0 %vm763_vm2, %v883_v1 }
 0x2b6   : > { %3152 = vmatpush3.bf16.msra.mxu1 %v3845_v59  ;;  %3170 = vmatpush3.bf16.xpose.msra.mxu0 %v1023_v3 }
 0x2b7   : > { %3171 = vmatprep.mubr.msk.bf16.mxu0 %vm3624_vm1, %v3623_v44  ;;  %3181 = vmatprep.subr.bf16.mxu0 %v3623_v44 }
 0x2b8   : > { %3153 = vmatprep.mubr.msk.bf16.mxu1 %vm3624_vm1, %v3623_v44  ;;  %3163 = vmatprep.subr.bf16.mxu1 %v3623_v44  ;;  %v1150_v4 = vpop.permute.xlu1 %1149 }
 0x2b9   : > { %v1155_v6 = vsel %vm763_vm2, %v1150_v4, 0 }
 0x2bd   : > { %3172 = vmatmul.mubr.msk.bf16.vlgmr.msra.gmra.mrb[8].mxu0 %vm763_vm2, %v1016_v5 }
 0x2be   : > { %3182 = vmatpush3.bf16.xpose.msra.mxu0 %v1155_v6  ;;  %3183 = vmatprep.mubr.msk.bf16.mxu0 %vm3624_vm1, %v3623_v44 }
 0x2bf   : > { %3193 = vmatprep.subr.bf16.mxu0 %v3623_v44 }
 0x2c5   : > { %3184 = vmatmul.mubr.msk.bf16.vlgmr.msra.gmra.mrb[12].mxu0 %vm763_vm2, %v1148_v7 }
 0x2c6   : > { %3201 = vmatprep.mubr.msk.bf16.mxu0 %vm3624_vm1, %v3623_v44 }
 0x388   : > { %v804_v8 = vpop.f32.mrb[0].mxu1  ;;  %v926_v9 = vpop.f32.mrb[4].mxu0 }
 0x389   : > { %v3149_v10 = vpop.f32.mrb[1].mxu1  ;;  %v3161_v11 = vpop.f32.mrb[5].mxu0  ;;  %v811_v12 = vsel %vm763_vm2, %v804_v8, -inf  ;;  %v933_v18 = vsel %vm763_vm2, %v926_v9, -inf }
 0x38a   : > { %v929_v13 = vpop.f32.mrb[6].mxu0  ;;  %812 = vmax.xlane.f32.xlu1 %v811_v12  ;;  %v807_v14 = vpop.f32.mrb[2].mxu1 }
 0x38b   : > { %v3150_v15 = vpop.f32.mrb[3].mxu1  ;;  %v3162_v16 = vpop.f32.mrb[7].mxu0  ;;  %v814_v17 = vsel %vm763_vm2, %v807_v14, -inf  ;;  %v936_v24 = vsel %vm763_vm2, %v929_v13, -inf }
 0x38c   : > { %815 = vmax.xlane.f32.xlu0 %v814_v17 }
 0x390   : > { %v3879_v19 = vpop.f32.mrb[8].mxu0  ;;  %934 = vmax.xlane.f32.xlu0 %v933_v18 }
 0x391   : > { %v3173_v20 = vpop.f32.mrb[9].mxu0  ;;  %v1066_v31 = vsel %vm763_vm2, %v3879_v19, -inf }
 0x392   : > { %v1062_v21 = vpop.f32.mrb[10].mxu0 }
 0x393   : > { %v3174_v23 = vpop.f32.mrb[11].mxu0  ;;  %v1069_v25 = vsel %vm763_vm2, %v1062_v21, -inf }
 0x394   : > { %937 = vmax.xlane.f32.xlu0 %v936_v24 }
 0x398   : > { %v3883_v26 = vpop.f32.mrb[12].mxu0  ;;  %1070 = vmax.xlane.f32.xlu0 %v1069_v25 }
 0x399   : > { %v3185_v27 = vpop.f32.mrb[13].mxu0  ;;  %v1198_v32 = vsel %vm763_vm2, %v3883_v26, -inf }
 0x39a   : > { %v1194_v28 = vpop.f32.mrb[14].mxu0 }
 0x39b   : > { %v3186_v29 = vpop.f32.mrb[15].mxu0  ;;  %953 = vrot.lane.b32.xlu1 %v3845_v59, %s4393_s20  ;;  %v1201_v30 = vsel %vm763_vm2, %v1194_v28, -inf  ;;  %s4425_s20 = smov 16  }
 0x39c   : > { %1202 = vmax.xlane.f32.xlu0 %v1201_v30 }
 0x3b2   : > { %1085 = vrot.lane.b32.xlu0 %v3845_v59, %s4399_s0  ;;  %s4419_s0 = smov 48  }
 0x3bf   : > { %1067 = vmax.xlane.f32.xlu1 %v1066_v31 }
 0x3c3   : > { %1199 = vmax.xlane.f32.xlu1 %v1198_v32 }
 0x3d4   : > { %1217 = vrot.lane.b32.xlu1 %v3845_v59, %s4391_s2  ;;  %s4421_s2 = smov 96  }
 0x417   : > { %v813_v33 = vpop.xlane.xlu1 %812 }
 0x418   : > { %v817_v34 = vsub.f32 %v804_v8, %v813_v33 }
 0x419   : > { %v816_v35 = vpop.xlane.xlu0 %815 }
 0x41a   : > { %v819_v36 = vmul.f32 1.442695, %v817_v34  ;;  %v818_v39 = vsub.f32 %v807_v14, %v816_v35 }
 0x41b   : > { %v954_v59 = vpop.permute.xlu1 %953 }
 0x41c   : > { %v821_v40 = vmul.f32 1.442695, %v818_v39  ;;  %3470 = vpow2.f32 %v819_v36 }
 0x41d   : > { %v935_v43 = vpop.xlane.xlu0 %934 }
 0x41e   : > { %3472 = vpow2.f32 %v821_v40  ;;  %v939_v46 = vsub.f32 %v926_v9, %v935_v43 }
 0x420   : > { %v941_v47 = vmul.f32 1.442695, %v939_v46 }
 0x421   : > { %v938_v48 = vpop.xlane.xlu0 %937 }
 0x422   : > { %3474 = vpow2.f32 %v941_v47  ;;  %v940_v49 = vsub.f32 %v929_v13, %v938_v48 }
 0x424   : > { %v943_v50 = vmul.f32 1.442695, %v940_v49 }
 0x425   : > { %v1071_v51 = vpop.xlane.xlu0 %1070 }
 0x426   : > { %3476 = vpow2.f32 %v943_v50  ;;  %v1073_v52 = vsub.f32 %v1062_v21, %v1071_v51  ;;  %v3471_v53 = vpop.eup %3470 }
 0x427   : > { %v823_v21 = vsel %vm763_vm2, %v3471_v53, 0.0 }
 0x428   : > { %v3473_v54 = vpop.eup %3472  ;;  %v1076_v55 = vmul.f32 1.442695, %v1073_v52 }
 0x429   : > { %v1203_v56 = vpop.xlane.xlu0 %1202  ;;  %v829_v57 = vpack.c.bf16 %v3473_v54, %v3471_v53  ;;  %v826_v7 = vsel %vm763_vm2, %v3473_v54, 0.0  ;;  %v3414_v53 = vld [vmem:[%s4370_s5] sm:$0xff]   ;;  %v3415_v54 = vld [vmem:[%s4370_s5 + $0x8] sm:$0xff]  }
 0x42a   : > { %3478 = vpow2.f32 %v1076_v55  ;;  %v1205_v58 = vsub.f32 %v1194_v28, %v1203_v56  ;;  %3194 = vmatpush3.bf16.msra.mxu0 %v3414_v53 }
 0x42b   : > { %3154 = vmatmul.mubr.msk.bf16.vlgmr.msra.gmra.mrb[4].mxu1 %vm763_vm2, %v829_v57  ;;  %3195 = vmatprep.subr.bf16.mxu0 %v3623_v44  ;;  %v3416_v57 = vld [vmem:[%s4370_s5 + $0x10] sm:$0xff]  }
 0x42c   : > { %v3475_v60 = vpop.eup %3474  ;;  %v1208_v61 = vmul.f32 1.442695, %v1205_v58  ;;  %3164 = vmatpush3.bf16.msra.mxu1 %v954_v59  ;;  %3165 = vmatprep.mubr.msk.bf16.mxu1 %vm3624_vm1, %v3623_v44 }
 0x42d   : > { %v945_v62 = vsel %vm763_vm2, %v3475_v60, 0.0  ;;  %3175 = vmatprep.subr.bf16.mxu1 %v3623_v44  ;;  %v1086_v2 = vpop.permute.xlu0 %1085 }
 0x42e   : > { %3480 = vpow2.f32 %v1208_v61  ;;  %946 = vadd.xlane.f32.xlu1 %v945_v62  ;;  %3196 = vmatpush3.bf16.msra.mxu0 %v3415_v54 }
 0x42f   : > { %3197 = vmatprep.subr.bf16.mxu0 %v3623_v44 }
 0x430   : > { %v3477_v63 = vpop.eup %3476 }
 0x431   : > { %v948_v0 = vsel %vm763_vm2, %v3477_v63, 0.0  ;;  %v951_v1 = vpack.c.bf16 %v3477_v63, %v3475_v60  ;;  %v3417_v63 = vld [vmem:[%s4370_s5 + $0x18] sm:$0xff]  }
 0x432   : > { %949 = vadd.xlane.f32.xlu0 %v948_v0  ;;  %3198 = vmatpush3.bf16.msra.mxu0 %v3416_v57 }
 0x433   : > { %3166 = vmatmul.mubr.msk.bf16.vlgmr.msra.gmra.mrb[8].mxu1 %vm763_vm2, %v951_v1  ;;  %3199 = vmatprep.subr.bf16.mxu0 %v3623_v44 }
 0x434   : > { %v3479_v3 = vpop.eup %3478  ;;  %3176 = vmatpush3.bf16.msra.mxu1 %v1086_v2  ;;  %3177 = vmatprep.mubr.msk.bf16.mxu1 %vm3624_vm1, %v3623_v44 }
 0x435   : > { %v1081_v4 = vsel %vm763_vm2, %v3479_v3, 0.0  ;;  %3187 = vmatprep.subr.bf16.mxu1 %v3623_v44 }
 0x436   : > { %1082 = vadd.xlane.f32.xlu1 %v1081_v4  ;;  %3200 = vmatpush3.bf16.msra.mxu0 %v3417_v63 }
 0x437   : > { %3217 = vmatprep.subr.bf16.mxu0 %v3623_v44 }
 0x438   : > { %v3481_v5 = vpop.eup %3480 }
 0x439   : > { %v1213_v6 = vsel %vm763_vm2, %v3481_v5, 0.0 }
 0x43a   : > { %1214 = vadd.xlane.f32.xlu1 %v1213_v6 }
 0x43e   : > { %827 = vadd.xlane.f32.xlu1 %v826_v7 }
 0x44c   : > { %v1068_v8 = vpop.xlane.xlu1 %1067 }
 0x44d   : > { %v1072_v9 = vsub.f32 %v3879_v19, %v1068_v8 }
 0x44f   : > { %v1074_v10 = vmul.f32 1.442695, %v1072_v9 }
 0x450   : > { %v1200_v11 = vpop.xlane.xlu1 %1199 }
 0x451   : > { %3482 = vpow2.f32 %v1074_v10  ;;  %v1204_v12 = vsub.f32 %v3883_v26, %v1200_v11 }
 0x453   : > { %v1206_v13 = vmul.f32 1.442695, %v1204_v12 }
 0x454   : > { %v1218_v17 = vpop.permute.xlu1 %1217 }
 0x455   : > { %3484 = vpow2.f32 %v1206_v13 }
 0x45b   : > { %v3483_v14 = vpop.eup %3482 }
 0x45c   : > { %v1078_v15 = vsel %vm763_vm2, %v3483_v14, 0.0  ;;  %v1084_v16 = vpack.c.bf16 %v3479_v3, %v3483_v14 }
 0x45d   : > { %1079 = vadd.xlane.f32.xlu0 %v1078_v15 }
 0x45e   : > { %3178 = vmatmul.mubr.msk.bf16.vlgmr.msra.gmra.mrb[12].mxu1 %vm763_vm2, %v1084_v16 }
 0x45f   : > { %v3485_v18 = vpop.eup %3484  ;;  %3188 = vmatpush3.bf16.msra.mxu1 %v1218_v17  ;;  %3189 = vmatprep.mubr.msk.bf16.mxu1 %vm3624_vm1, %v3623_v44 }
 0x460   : > { %v1210_v19 = vsel %vm763_vm2, %v3485_v18, 0.0  ;;  %v1216_v20 = vpack.c.bf16 %v3481_v5, %v3485_v18  ;;  %3205 = vmatprep.subr.bf16.mxu1 %v3623_v44  ;;  %v2936_v18 = vld [vmem:[%s4371_s6] ss:$0 sm:$0xff] }
 0x461   : > { %1211 = vadd.xlane.f32.xlu0 %v1210_v19 }
 0x465   : > { %824 = vadd.xlane.f32.xlu0 %v823_v21 }
 0x466   : > { %3190 = vmatmul.mubr.msk.bf16.vlgmr.msra.gmra.mrb[16].mxu1 %vm763_vm2, %v1216_v20 }
 0x467   : > { %3213 = vmatprep.mubr.msk.bf16.mxu1 %vm3624_vm1, %v3623_v44 }
 0x4bb   : > { %v947_v23 = vpop.xlane.xlu1 %946 }
 0x4bf   : > { %v950_v24 = vpop.xlane.xlu0 %949 }
 0x4c3   : > { %v1083_v25 = vpop.xlane.xlu1 %1082 }
 0x4c7   : > { %v1215_v27 = vpop.xlane.xlu1 %1214 }
 0x4cb   : > { %v828_v30 = vpop.xlane.xlu1 %827 }
 0x4ea   : > { %v1080_v26 = vpop.xlane.xlu0 %1079 }
 0x4ee   : > { %v1212_v28 = vpop.xlane.xlu0 %1211 }
 0x4f2   : > { %v825_v29 = vpop.xlane.xlu0 %824 }
 0x4f3   : > { %3486 = vrcp.f32 %v825_v29 }
 0x4f4   : > { %3488 = vrcp.f32 %v828_v30 }
 0x4f5   : > { %3490 = vrcp.f32 %v947_v23 }
 0x4f6   : > { %3492 = vrcp.f32 %v950_v24 }
 0x4f7   : > { %3494 = vrcp.f32 %v1080_v26 }
 0x4f8   : > { %3496 = vrcp.f32 %v1083_v25 }
 0x4f9   : > { %3498 = vrcp.f32 %v1212_v28 }
 0x4fa   : > { %3500 = vrcp.f32 %v1215_v27 }
 0x4fd   : > { %v3487_v31 = vpop.eup %3486 }
 0x4fe   : > { %v868_v32 = vpop.f32.mrb[4].mxu1  ;;  %v3489_v35 = vpop.eup %3488 }
 0x4ff   : > { %v877_v33 = vmul.f32 %v3487_v31, %v868_v32  ;;  %v3155_v34 = vpop.f32.mrb[5].mxu1  ;;  %v3491_v43 = vpop.eup %3490 }
 0x500   : > { %v871_v36 = vpop.f32.mrb[6].mxu1  ;;  %v3493_v49 = vpop.eup %3492 }
 0x501   : > { %879 = vst.msk [vmem:[#allocation2] sm:$0xff] %vm763_vm2, %v877_v33  ;;  %v878_v39 = vmul.f32 %v3489_v35, %v871_v36  ;;  %v3156_v40 = vpop.f32.mrb[7].mxu1  ;;  %v3495_v55 = vpop.eup %3494 }
 0x502   : > { %v3497_v62 = vpop.eup %3496 }
 0x503   : > { %880 = vst.msk [vmem:[#allocation2 + $0x8] sm:$0xff] %vm763_vm2, %v878_v39  ;;  %v3499_v1 = vpop.eup %3498 }
 0x504   : > { %v3501_v5 = vpop.eup %3500 }
 0x506   : > { %v993_v46 = vpop.f32.mrb[8].mxu1 }
 0x507   : > { %v1002_v47 = vmul.f32 %v3491_v43, %v993_v46  ;;  %v3167_v48 = vpop.f32.mrb[9].mxu1  ;;  %v3419_v43 = vld [vmem:[%s4374_s9 + $0x8] sm:$0xff]   ;;  %v3420_v46 = vld [vmem:[%s4374_s9 + $0x10] sm:$0xff]  }
 0x508   : > { %v996_v50 = vpop.f32.mrb[10].mxu1 }
 0x509   : > { %v1003_v51 = vmul.f32 %v3493_v49, %v996_v50  ;;  %1006 = vrot.lane.b32.xlu0 %v1002_v47, %s4395_s27  ;;  %v3168_v52 = vpop.f32.mrb[11].mxu1  ;;  %v3421_v47 = vld [vmem:[%s4374_s9 + $0x18] sm:$0xff]  }
 0x50b   : > { %1008 = vrot.lane.b32.xlu1 %v1003_v51, %s4395_s27 }
 0x531   : > { %v1125_v56 = vpop.f32.mrb[12].mxu1 }
 0x532   : > { %v1134_v58 = vmul.f32 %v3495_v55, %v1125_v56  ;;  %v3179_v59 = vpop.f32.mrb[13].mxu1  ;;  %v2942_v56 = vld [vmem:[%s4372_s7] ss:$0 sm:$0xff] }
 0x533   : > { %v1128_v60 = vpop.f32.mrb[14].mxu1 }
 0x534   : > { %1138 = vrot.lane.b32.xlu1 %v1134_v58, %s4397_s26  ;;  %v3180_v61 = vpop.f32.mrb[15].mxu1  ;;  %v1135_v0 = vmul.f32 %v3497_v62, %v1128_v60  ;;  %v2943_v60 = vld [vmem:[%s4373_s8] ss:$0 sm:$0xff] }
 0x538   : > { %1140 = vrot.lane.b32.xlu1 %v1135_v0, %s4397_s26  ;;  %s4420_s26 = smov 64  }
 0x539   : > { %v1257_v2 = vpop.f32.mrb[16].mxu1 }
 0x53a   : > { %v1266_v3 = vmul.f32 %v3499_v1, %v1257_v2  ;;  %v3191_v4 = vpop.f32.mrb[17].mxu1  ;;  %v3422_v1 = vld [vmem:[%s4376_s11] sm:$0xff]   ;;  %v3423_v2 = vld [vmem:[%s4376_s11 + $0x8] sm:$0xff]  }
 0x53b   : > { %v1260_v6 = vpop.f32.mrb[18].mxu1  ;;  %v3426_v4 = vld [vmem:[%s4376_s11 + $0x20] sm:$0xff]  }
 0x53c   : > { %v1267_v7 = vmul.f32 %v3501_v5, %v1260_v6  ;;  %1270 = vrot.lane.b32.xlu0 %v1266_v3, %s4402_s25  ;;  %v3192_v8 = vpop.f32.mrb[19].mxu1  ;;  %v3424_v3 = vld [vmem:[%s4376_s11 + $0x10] sm:$0xff]   ;;  %v3427_v5 = vld [vmem:[%s4376_s11 + $0x28] sm:$0xff]  }
 0x53d   : > { %v3428_v6 = vld [vmem:[%s4376_s11 + $0x30] sm:$0xff]   ;;  %v2944_v8 = vld [vmem:[%s4375_s10] ss:$0 sm:$0xff] }
 0x53e   : > { %1272 = vrot.lane.b32.xlu1 %v1267_v7, %s4402_s25  ;;  %v3429_v7 = vld [vmem:[%s4376_s11 + $0x38] sm:$0xff]   ;;  %s4423_s25 = smov 80  }
 0x57b   : > { %v1007_v9 = vpop.permute.xlu0 %1006 }
 0x57c   : > { %1013 = vst.msk [vmem:[#allocation2] sm:$0xff] %vm1012_vm3, %v1007_v9 }
 0x57d   : > { %v1009_v10 = vpop.permute.xlu1 %1008 }
 0x57e   : > { %1014 = vst.msk [vmem:[#allocation2 + $0x8] sm:$0xff] %vm1012_vm3, %v1009_v10 }
 0x5a6   : > { %v1139_v11 = vpop.permute.xlu1 %1138 }
 0x5a7   : > { %1145 = vst.msk [vmem:[#allocation2] sm:$0xff] %vm1144_vm4, %v1139_v11 }
 0x5aa   : > { %v1141_v12 = vpop.permute.xlu1 %1140 }
 0x5ab   : > { %1146 = vst.msk [vmem:[#allocation2 + $0x8] sm:$0xff] %vm1144_vm4, %v1141_v12 }
 0x5ae   : > { %v1271_v13 = vpop.permute.xlu0 %1270 }
 0x5af   : > { %1277 = vst.msk [vmem:[#allocation2] sm:$0xff] %vm1276_vm5, %v1271_v13 }
 0x5b0   : > { %v1273_v14 = vpop.permute.xlu1 %1272 }
 0x5b1   : > { %1278 = vst.msk [vmem:[#allocation2 + $0x8] sm:$0xff] %vm1276_vm5, %v1273_v14 }
 0x5b6   : > { %v1279_v15 = vld [vmem:[#allocation2] sm:$0xff] }
 0x5b8   : > { %v1280_v16 = vld [vmem:[#allocation2 + $0x8] sm:$0xff] }
 0x5b9   : > { %v1281_v17 = vpack.c.bf16 %v1280_v16, %v1279_v15 }
 0x5bb   : > { %3202 = vmatmul.mubr.msk.bf16.vlgmr.msra.gmra.mrb[16].mxu0 %vm605_vm0, %v1281_v17 }
 0x5bc   : > { %3233 = vmatprep.mubr.msk.bf16.mxu0 %vm3624_vm1, %v3623_v44  ;;  %3218 = vmatpush3.bf16.msra.mxu0 %v3422_v1  ;;  %v3436_v1 = vld [vmem:[%s4416_s29 + $0x60] ss:$8 sps:$4 sm:$0xff]  }
 0x5bd   : > { %3219 = vmatprep.subr.bf16.mxu0 %v3623_v44 }
 0x5c0   : > { %3220 = vmatpush3.bf16.msra.mxu0 %v3423_v2  ;;  %v3439_v2 = vld [vmem:[%s4416_s29 + $0x70] ss:$8 sps:$4 sm:$0xff]  }
 0x5c1   : > { %3221 = vmatprep.subr.bf16.mxu0 %v3623_v44 }
 0x5c4   : > { %3222 = vmatpush3.bf16.msra.mxu0 %v3424_v3  ;;  %v3441_v3 = vld [vmem:[%s4416_s29 + $0x74] ss:$8 sps:$4 sm:$0xff]  }
 0x5c5   : > { %3223 = vmatprep.subr.bf16.mxu0 %v3623_v44 }
 0x68e   : > { %v1358_v19 = vpop.f32.mrb[16].mxu0 }
 0x68f   : > { %v1359_v20 = vadd.f32 %v2936_v18, %v1358_v19  ;;  %v3203_v21 = vpop.f32.mrb[17].mxu0 }
 0x690   : > { %v1361_v23 = vpop.f32.mrb[18].mxu0 }
 0x691   : > { %v1362_v24 = vadd.f32 %v2936_v18, %v1361_v23  ;;  %v3204_v25 = vpop.f32.mrb[19].mxu0  ;;  %v1365_v26 = vadd.f32 %v1359_v20, %v3821_v37 }
 0x693   : > { %v1369_v27 = vsel %vm605_vm0, %v1365_v26, 0.0  ;;  %v1366_v28 = vadd.f32 %v1362_v24, %v3823_v38  ;;  %v3418_v38 = vld [vmem:[%s4374_s9] sm:$0xff]  }
 0x694   : > { %1370 = vadd.xlane.f32.xlu0 %v1369_v27  ;;  %3206 = vmatpush3.bf16.msra.mxu1 %v3418_v38 }
 0x695   : > { %v1372_v29 = vsel %vm605_vm0, %v1366_v28, 0.0  ;;  %3207 = vmatprep.subr.bf16.mxu1 %v3623_v44 }
 0x696   : > { %1373 = vadd.xlane.f32.xlu1 %v1372_v29 }
 0x698   : > { %3208 = vmatpush3.bf16.msra.mxu1 %v3419_v43 }
 0x699   : > { %3209 = vmatprep.subr.bf16.mxu1 %v3623_v44 }
 0x69c   : > { %3210 = vmatpush3.bf16.msra.mxu1 %v3420_v46 }
 0x69d   : > { %3211 = vmatprep.subr.bf16.mxu1 %v3623_v44 }
 0x6a0   : > { %3212 = vmatpush3.bf16.msra.mxu1 %v3421_v47 }
 0x721   : > { %v1371_v30 = vpop.xlane.xlu0 %1370 }
 0x722   : > { %v1375_v31 = vmul.f32 0.015625, %v1371_v30 }
 0x723   : > { %v1374_v32 = vpop.xlane.xlu1 %1373 }
 0x724   : > { %v1377_v33 = vsub.f32 %v1365_v26, %v1375_v31  ;;  %v1376_v34 = vmul.f32 0.015625, %v1374_v32 }
 0x726   : > { %v1378_v35 = vsub.f32 %v1366_v28, %v1376_v34  ;;  %v1379_v36 = vmul.f32 %v1377_v33, %v1377_v33 }
 0x728   : > { %v1381_v39 = vsel %vm605_vm0, %v1379_v36, 0.0  ;;  %v1380_v40 = vmul.f32 %v1378_v35, %v1378_v35 }
 0x729   : > { %1382 = vadd.xlane.f32.xlu0 %v1381_v39 }
 0x72a   : > { %v1384_v37 = vsel %vm605_vm0, %v1380_v40, 0.0 }
 0x72d   : > { %1385 = vadd.xlane.f32.xlu0 %v1384_v37 }
 0x7b6   : > { %v1383_v48 = vpop.xlane.xlu0 %1382 }
 0x7b7   : > { %v1387_v49 = vmul.f32 0.015625, %v1383_v48 }
 0x7b9   : > { %v1389_v50 = vadd.f32 1e-12, %v1387_v49 }
 0x7ba   : > { %v1386_v51 = vpop.xlane.xlu0 %1385 }
 0x7bb   : > { %3502 = vrsqrt.f32 %v1389_v50  ;;  %v1388_v52 = vmul.f32 0.015625, %v1386_v51 }
 0x7bd   : > { %v1390_v53 = vadd.f32 1e-12, %v1388_v52 }
 0x7bf   : > { %3504 = vrsqrt.f32 %v1390_v53 }
 0x7c5   : > { %v3503_v54 = vpop.eup %3502 }
 0x7c6   : > { %v1393_v55 = vmul.f32 %v3503_v54, %v1377_v33 }
 0x7c8   : > { %v1401_v58 = vmul.f32 %v2942_v56, %v1393_v55 }
 0x7c9   : > { %v3505_v57 = vpop.eup %3504 }
 0x7ca   : > { %v1394_v59 = vmul.f32 %v3505_v57, %v1378_v35  ;;  %v3984_v62 = vadd.f32 %v2943_v60, %v1401_v58  ;;  %v2950_v35 = vld [vmem:[%s4377_s12] ss:$0 sm:$0xff] }
 0x7cc   : > { %v1402_v61 = vmul.f32 %v2942_v56, %v1394_v59 }
 0x7ce   : > { %v3986_v63 = vadd.f32 %v2943_v60, %v1402_v61  ;;  %v3432_v60 = vld [vmem:[%s4416_s29 + $0x44] ss:$8 sps:$4 sm:$0xff]   ;;  %v3430_v61 = vld [vmem:[%s4416_s29 + $0x40] ss:$8 sps:$4 sm:$0xff]  }
 0x7cf   : > { %1738 = vmatprep.subr.bf16.mxu1 %v3432_v60 }
 0x7d0   : > { %v1411_v0 = vpack.c.bf16 %v3986_v63, %v3984_v62 }
 0x7d2   : > { %3214 = vmatmul.mubr.msk.bf16.vlgmr.msra.gmra.mrb[20].mxu1 %vm605_vm0, %v1411_v0  ;;  %v3438_v0 = vld [vmem:[%s4416_s29 + $0x64] ss:$8 sps:$4 sm:$0xff]  }
 0x7d3   : > { %1770 = vmatprep.mubr.bf16.mxu1 %v3622_v22  ;;  %v3425_v22 = vld [vmem:[%s4376_s11 + $0x18] sm:$0xff]   ;;  %1739 = vmatpush1.bf16.msra.mxu1 %v3430_v61 }
 0x7d4   : > { %3224 = vmatpush3.bf16.msra.mxu0 %v3425_v22 }
 0x7d5   : > { %3225 = vmatprep.subr.bf16.mxu0 %v3623_v44 }
 0x7d8   : > { %3226 = vmatpush3.bf16.msra.mxu0 %v3426_v4 }
 0x7d9   : > { %3227 = vmatprep.subr.bf16.mxu0 %v3623_v44 }
 0x7dc   : > { %3228 = vmatpush3.bf16.msra.mxu0 %v3427_v5 }
 0x7dd   : > { %3229 = vmatprep.subr.bf16.mxu0 %v3623_v44 }
 0x7e0   : > { %3230 = vmatpush3.bf16.msra.mxu0 %v3428_v6 }
 0x7e1   : > { %3231 = vmatprep.subr.bf16.mxu0 %v3623_v44 }
 0x7e4   : > { %3232 = vmatpush3.bf16.msra.mxu0 %v3429_v7 }
 0x7e5   : > { %3249 = vmatprep.subr.bf16.mxu0 %v3623_v44 }
 0x8a5   : > { %v1488_v9 = vpop.f32.mrb[20].mxu1 }
 0x8a6   : > { %v1489_v10 = vadd.f32 %v2944_v8, %v1488_v9  ;;  %v3215_v11 = vpop.f32.mrb[21].mxu1 }
 0x8a7   : > { %v1491_v12 = vpop.f32.mrb[22].mxu1 }
 0x8a8   : > { %v1497_v13 = vmul.f32 0.044715, %v1489_v10  ;;  %v1492_v14 = vadd.f32 %v2944_v8, %v1491_v12  ;;  %v3216_v15 = vpop.f32.mrb[23].mxu1  ;;  %v1495_v29 = vmul.f32 0.5, %v1489_v10 }
 0x8a9   : > { %v2960_v15 = vld [vmem:[%s4379_s14] ss:$0 sm:$0xff] }
 0x8aa   : > { %v1499_v16 = vmul.f32 %v1497_v13, %v1489_v10  ;;  %v1498_v17 = vmul.f32 0.044715, %v1492_v14  ;;  %v1496_v30 = vmul.f32 0.5, %v1492_v14 }
 0x8ac   : > { %v1501_v18 = vmul.f32 %v1499_v16, %v1489_v10  ;;  %v1500_v19 = vmul.f32 %v1498_v17, %v1492_v14 }
 0x8ae   : > { %v1503_v20 = vadd.f32 %v1501_v18, %v1489_v10  ;;  %v1502_v21 = vmul.f32 %v1500_v19, %v1492_v14  ;;  %v2959_v10 = vld [vmem:[%s4378_s13] ss:$0 sm:$0xff] }
 0x8b0   : > { %v1505_v23 = vmul.f32 0.7978846, %v1503_v20  ;;  %v1504_v24 = vadd.f32 %v1502_v21, %v1492_v14  ;;  %v2969_v20 = vld [vmem:[%s4369_s4 + $0x2] sm:$0x3] }
 0x8b1   : > { %v1688_v21 = vrot.slane %v2969_v20, %v662_v42 }
 0x8b2   : > { %3506 = vtanh.f32 %v1505_v23  ;;  %v1506_v25 = vmul.f32 0.7978846, %v1504_v24  ;;  %v1692_v24 = vrot.slane %v2969_v20, %v666_v45 }
 0x8b4   : > { %3508 = vtanh.f32 %v1506_v25 }
 0x8bc   : > { %v3507_v26 = vpop.eup %3506 }
 0x8bd   : > { %v1509_v27 = vadd.f32 1.0, %v3507_v26 }
 0x8be   : > { %v3509_v28 = vpop.eup %3508 }
 0x8bf   : > { %v1510_v31 = vadd.f32 1.0, %v3509_v28  ;;  %v1511_v32 = vmul.f32 %v1509_v27, %v1495_v29 }
 0x8c1   : > { %v1512_v33 = vmul.f32 %v1510_v31, %v1496_v30 }
 0x8c3   : > { %v1513_v34 = vpack.c.bf16 %v1512_v33, %v1511_v32 }
 0x8c5   : > { %3234 = vmatmul.mubr.bf16.vlgmr.msra.gmra.mrb[20].mxu0 %v1513_v34 }
 0x8c6   : > { %3251 = vmatprep.mubr.msk.bf16.mxu0 %vm3624_vm1, %v3623_v44 }
 0x998   : > { %v1619_v36 = vpop.f32.mrb[20].mxu0 }
 0x999   : > { %v1620_v39 = vadd.f32 %v2950_v35, %v1619_v36  ;;  %v3235_v40 = vpop.f32.mrb[21].mxu0 }
 0x99a   : > { %v1622_v37 = vpop.f32.mrb[22].mxu0 }
 0x99b   : > { %v1623_v38 = vadd.f32 %v2950_v35, %v1622_v37  ;;  %v3236_v43 = vpop.f32.mrb[23].mxu0  ;;  %v1626_v46 = vadd.f32 %v1620_v39, %v3984_v62  ;;  %v3435_v62 = vld [vmem:[%s4416_s29 + $0x54] ss:$8 sps:$4 sm:$0xff]  }
 0x99c   : > { %1740 = vmatprep.subr.bf16.mxu1 %v3435_v62 }
 0x99d   : > { %v1630_v47 = vsel %vm605_vm0, %v1626_v46, 0.0  ;;  %v1627_v48 = vadd.f32 %v1623_v38, %v3986_v63  ;;  %v3433_v63 = vld [vmem:[%s4416_s29 + $0x50] ss:$8 sps:$4 sm:$0xff]  }
 0x99e   : > { %1631 = vadd.xlane.f32.xlu0 %v1630_v47  ;;  %1741 = vmatpush1.bf16.msra.mxu1 %v3433_v63 }
 0x99f   : > { %v1633_v49 = vsel %vm605_vm0, %v1627_v48, 0.0  ;;  %1742 = vmatprep.subr.bf16.mxu1 %v3438_v0 }
 0x9a0   : > { %1634 = vadd.xlane.f32.xlu1 %v1633_v49 }
 0x9a2   : > { %1743 = vmatpush1.bf16.msra.mxu1 %v3436_v1 }
 0x9a3   : > { %1744 = vmatprep.subr.bf16.mxu1 %v3441_v3 }
 0x9a6   : > { %1745 = vmatpush1.bf16.msra.mxu1 %v3439_v2 }
 0x9a7   : > { %3237 = vmatprep.subr.bf16.mxu1 %v3623_v44 }
 0xa2b   : > { %v1632_v50 = vpop.xlane.xlu0 %1631 }
 0xa2c   : > { %v1636_v51 = vmul.f32 0.015625, %v1632_v50 }
 0xa2d   : > { %v1635_v52 = vpop.xlane.xlu1 %1634 }
 0xa2e   : > { %v1638_v53 = vsub.f32 %v1626_v46, %v1636_v51  ;;  %v1637_v54 = vmul.f32 0.015625, %v1635_v52 }
 0xa30   : > { %v1639_v55 = vsub.f32 %v1627_v48, %v1637_v54  ;;  %v1640_v56 = vmul.f32 %v1638_v53, %v1638_v53 }
 0xa32   : > { %v1642_v57 = vsel %vm605_vm0, %v1640_v56, 0.0  ;;  %v1641_v58 = vmul.f32 %v1639_v55, %v1639_v55 }
 0xa33   : > { %1643 = vadd.xlane.f32.xlu0 %v1642_v57 }
 0xa34   : > { %v1645_v59 = vsel %vm605_vm0, %v1641_v58, 0.0 }
 0xa35   : > { %1646 = vadd.xlane.f32.xlu1 %v1645_v59 }
 0xac0   : > { %v1644_v22 = vpop.xlane.xlu0 %1643 }
 0xac1   : > { %v1648_v4 = vmul.f32 0.015625, %v1644_v22 }
 0xac2   : > { %v1647_v5 = vpop.xlane.xlu1 %1646 }
 0xac3   : > { %v1650_v6 = vadd.f32 1e-12, %v1648_v4  ;;  %v1649_v7 = vmul.f32 0.015625, %v1647_v5 }
 0xac5   : > { %3510 = vrsqrt.f32 %v1650_v6  ;;  %v1651_v8 = vadd.f32 1e-12, %v1649_v7 }
 0xac7   : > { %3512 = vrsqrt.f32 %v1651_v8 }
 0xacf   : > { %v3511_v9 = vpop.eup %3510 }
 0xad0   : > { %v1654_v11 = vmul.f32 %v3511_v9, %v1638_v53 }
 0xad1   : > { %v3513_v12 = vpop.eup %3512 }
 0xad2   : > { %v1662_v13 = vmul.f32 %v2959_v10, %v1654_v11  ;;  %v1655_v14 = vmul.f32 %v3513_v12, %v1639_v55 }
 0xad4   : > { %v1663_v16 = vmul.f32 %v2959_v10, %v1655_v14  ;;  %v4069_v17 = vadd.f32 %v2960_v15, %v1662_v13 }
 0xad6   : > { %v4071_v18 = vadd.f32 %v2960_v15, %v1663_v16 }
 0xad8   : > { %v1672_v19 = vpack.c.bf16 %v4071_v18, %v4069_v17 }
 0xada   : > { %2978 = vmatmul.mubr.msk.bf16.vlgmr.msra.gmra.mrb[24].mxu1 %vm605_vm0, %v1672_v19 }
 0xadb   : > { %3239 = vmatprep.mubr.msk.bf16.mxu1 %vm3624_vm1, %v3623_v44 }
 0xbad   : > { %v1772_v23 = vpop.f32.mrb[24].mxu1 }
 0xbae   : > { %v1773_v25 = vadd.f32 %v1772_v23, %v1688_v21  ;;  %v1774_v26 = vpop.f32.mrb[25].mxu1 }
 0xbaf   : > { %v1776_v27 = vpop.f32.mrb[26].mxu1  ;;  %v1775_v30 = vadd.f32 %v1774_v26, %v1692_v24 }
 0xbb0   : > { %v1777_v28 = vadd.f32 %v1776_v27, %v1688_v21  ;;  %v1778_v29 = vpop.f32.mrb[27].mxu1  ;;  %v1781_v32 = vmul.f32 0.25, %v1773_v25 }
 0xbb1   : > { %v1779_v31 = vadd.f32 %v1778_v29, %v1692_v24 }
 0xbb2   : > { %v1782_v33 = vmul.f32 0.25, %v1777_v28  ;;  %v1784_v34 = vpack.c.bf16 %v1777_v28, %v1773_v25 }
 0xbb3   : > { %v4085_v35 = vpack.c.bf16 %v1779_v31, %v1775_v30 }
 0xbb4   : > { %v1783_v36 = vpack.c.bf16 %v1782_v33, %v1781_v32  ;;  %1908 = vrot.lane.b32.xlu1 %v1784_v34, %s4419_s0  ;;  %1786 = vrot.lane.b32.xlu0 %v1784_v34, %s4420_s26 }
 0xbb8   : > { %2038 = vrot.lane.b32.xlu0 %v1783_v36, %s4421_s2  ;;  %1906 = vrot.lane.b32.xlu1 %v1783_v36, %s4422_s28 }
 0xbbc   : > { %2169 = vrot.lane.b32.xlu0 %v1783_v36, %s4423_s25  ;;  %2040 = vrot.lane.b32.xlu1 %v1784_v34, %s4424_s24 }
 0xbc0   : > { %2171 = vrot.lane.b32.xlu1 %v1784_v34, %s4425_s20 }
 0xc26   : > { %v1909_v41 = vpop.permute.xlu1 %1908  ;;  %v1787_v42 = vpop.permute.xlu0 %1786 }
 0xc27   : > { %v1914_v45 = vsel %vm763_vm2, %v1909_v41, 0  ;;  %v1792_v39 = vsel %vm763_vm2, %v1787_v42, 0 }
 0xc28   : > { %3238 = vmatpush3.bf16.xpose.msra.mxu1 %v1792_v39  ;;  %3250 = vmatpush3.bf16.xpose.msra.mxu0 %v1914_v45 }
 0xc29   : > { %3243 = vmatprep.subr.bf16.mxu1 %v3623_v44  ;;  %3261 = vmatprep.subr.bf16.mxu0 %v3623_v44 }
 0xc2a   : > { %v1907_v40 = vpop.permute.xlu1 %1906  ;;  %v2039_v46 = vpop.permute.xlu0 %2038 }
 0xc2e   : > { %v2041_v37 = vpop.permute.xlu1 %2040  ;;  %v2170_v48 = vpop.permute.xlu0 %2169 }
 0xc2f   : > { %v2046_v38 = vsel %vm763_vm2, %v2041_v37, 0  ;;  %3240 = vmatmul.mubr.msk.bf16.vlgmr.msra.gmra.mrb[28].mxu1 %vm763_vm2, %v1783_v36  ;;  %3252 = vmatmul.mubr.msk.bf16.vlgmr.msra.gmra.mrb[24].mxu0 %vm763_vm2, %v1907_v40 }
 0xc30   : > { %3244 = vmatpush3.bf16.msra.mxu1 %v4085_v35  ;;  %3262 = vmatpush3.bf16.xpose.msra.mxu0 %v2046_v38 }
 0xc31   : > { %3263 = vmatprep.mubr.msk.bf16.mxu0 %vm3624_vm1, %v3623_v44  ;;  %3273 = vmatprep.subr.bf16.mxu0 %v3623_v44 }
 0xc32   : > { %3245 = vmatprep.mubr.msk.bf16.mxu1 %vm3624_vm1, %v3623_v44  ;;  %3255 = vmatprep.subr.bf16.mxu1 %v3623_v44  ;;  %v2172_v43 = vpop.permute.xlu1 %2171 }
 0xc33   : > { %v2177_v47 = vsel %vm763_vm2, %v2172_v43, 0 }
 0xc37   : > { %3264 = vmatmul.mubr.msk.bf16.vlgmr.msra.gmra.mrb[28].mxu0 %vm763_vm2, %v2039_v46 }
 0xc38   : > { %3274 = vmatpush3.bf16.xpose.msra.mxu0 %v2177_v47  ;;  %3275 = vmatprep.mubr.msk.bf16.mxu0 %vm3624_vm1, %v3623_v44 }
 0xc39   : > { %3285 = vmatprep.subr.bf16.mxu0 %v3623_v44 }
 0xc3f   : > { %3276 = vmatmul.mubr.msk.bf16.vlgmr.msra.gmra.mrb[32].mxu0 %vm763_vm2, %v2170_v48 }
 0xc40   : > { %3293 = vmatprep.mubr.msk.bf16.mxu0 %vm3624_vm1, %v3623_v44 }
 0xd02   : > { %v1828_v49 = vpop.f32.mrb[28].mxu1  ;;  %v1950_v50 = vpop.f32.mrb[24].mxu0 }
 0xd03   : > { %v3241_v51 = vpop.f32.mrb[29].mxu1  ;;  %v3253_v52 = vpop.f32.mrb[25].mxu0  ;;  %v1835_v53 = vsel %vm763_vm2, %v1828_v49, -inf  ;;  %v1957_v59 = vsel %vm763_vm2, %v1950_v50, -inf }
 0xd04   : > { %v1953_v54 = vpop.f32.mrb[26].mxu0  ;;  %1836 = vmax.xlane.f32.xlu1 %v1835_v53  ;;  %v1831_v55 = vpop.f32.mrb[30].mxu1 }
 0xd05   : > { %v3242_v56 = vpop.f32.mrb[31].mxu1  ;;  %v3254_v57 = vpop.f32.mrb[27].mxu0  ;;  %v1838_v58 = vsel %vm763_vm2, %v1831_v55, -inf  ;;  %v1960_v0 = vsel %vm763_vm2, %v1953_v54, -inf }
 0xd06   : > { %1839 = vmax.xlane.f32.xlu0 %v1838_v58 }
 0xd0a   : > { %v4119_v60 = vpop.f32.mrb[28].mxu0  ;;  %1958 = vmax.xlane.f32.xlu0 %v1957_v59 }
 0xd0b   : > { %v3265_v61 = vpop.f32.mrb[29].mxu0  ;;  %v2089_v6 = vsel %vm763_vm2, %v4119_v60, -inf }
 0xd0c   : > { %v2085_v62 = vpop.f32.mrb[30].mxu0 }
 0xd0d   : > { %v3266_v63 = vpop.f32.mrb[31].mxu0  ;;  %v2092_v1 = vsel %vm763_vm2, %v2085_v62, -inf }
 0xd0e   : > { %1961 = vmax.xlane.f32.xlu0 %v1960_v0 }
 0xd12   : > { %v4123_v2 = vpop.f32.mrb[32].mxu0  ;;  %2093 = vmax.xlane.f32.xlu0 %v2092_v1 }
 0xd13   : > { %v3277_v3 = vpop.f32.mrb[33].mxu0  ;;  %v2220_v7 = vsel %vm763_vm2, %v4123_v2, -inf }
 0xd14   : > { %v2216_v22 = vpop.f32.mrb[34].mxu0 }
 0xd15   : > { %v3278_v4 = vpop.f32.mrb[35].mxu0  ;;  %1977 = vrot.lane.b32.xlu1 %v4085_v35, %s4422_s28  ;;  %v2223_v5 = vsel %vm763_vm2, %v2216_v22, -inf  ;;  %s3632_s28 = smov [#allocation3]  }
 0xd16   : > { %2224 = vmax.xlane.f32.xlu0 %v2223_v5 }
 0xd2c   : > { %2108 = vrot.lane.b32.xlu0 %v4085_v35, %s4421_s2  ;;  %s593_s2 = sand.u32 1, %s3612_s30  }
 0xd39   : > { %2090 = vmax.xlane.f32.xlu1 %v2089_v6 }
 0xd3d   : > { %2221 = vmax.xlane.f32.xlu1 %v2220_v7 }
 0xd4e   : > { %2239 = vrot.lane.b32.xlu1 %v4085_v35, %s4423_s25  ;;  %s3562_s25 = sshll.u32 %s3632_s28, 4  ;;  %s3563_s25 = int_to_ptr.vmem [resolvable:$false] %s3562_s25 }
 0xd4f   : > { %s3564_s27 = scalar_lea.vmem %s3563_s25, 32 }
 0xd91   : > { %v1837_v8 = vpop.xlane.xlu1 %1836 }
 0xd92   : > { %v1841_v9 = vsub.f32 %v1828_v49, %v1837_v8 }
 0xd93   : > { %v1840_v10 = vpop.xlane.xlu0 %1839 }
 0xd94   : > { %v1843_v11 = vmul.f32 1.442695, %v1841_v9  ;;  %v1842_v12 = vsub.f32 %v1831_v55, %v1840_v10 }
 0xd95   : > { %v1978_v31 = vpop.permute.xlu1 %1977 }
 0xd96   : > { %v1845_v13 = vmul.f32 1.442695, %v1842_v12  ;;  %3514 = vpow2.f32 %v1843_v11 }
 0xd97   : > { %v1959_v14 = vpop.xlane.xlu0 %1958 }
 0xd98   : > { %3516 = vpow2.f32 %v1845_v13  ;;  %v1963_v15 = vsub.f32 %v1950_v50, %v1959_v14 }
 0xd9a   : > { %v1965_v16 = vmul.f32 1.442695, %v1963_v15 }
 0xd9b   : > { %v1962_v19 = vpop.xlane.xlu0 %1961 }
 0xd9c   : > { %3518 = vpow2.f32 %v1965_v16  ;;  %v1964_v20 = vsub.f32 %v1953_v54, %v1962_v19 }
 0xd9e   : > { %v1967_v21 = vmul.f32 1.442695, %v1964_v20  ;;  %v3442_v20 = vld [vmem:[%s4370_s5 + $0x20] sm:$0xff]  }
 0xd9f   : > { %v2094_v23 = vpop.xlane.xlu0 %2093  ;;  %3286 = vmatpush3.bf16.msra.mxu0 %v3442_v20 }
 0xda0   : > { %3520 = vpow2.f32 %v1967_v21  ;;  %v2096_v24 = vsub.f32 %v2085_v62, %v2094_v23  ;;  %v3515_v25 = vpop.eup %3514  ;;  %3287 = vmatprep.subr.bf16.mxu0 %v3623_v44  ;;  %v3443_v21 = vld [vmem:[%s4370_s5 + $0x28] sm:$0xff]  }
 0xda1   : > { %v1847_v58 = vsel %vm763_vm2, %v3515_v25, 0.0 }
 0xda2   : > { %v3517_v26 = vpop.eup %3516  ;;  %v2099_v27 = vmul.f32 1.442695, %v2096_v24 }
 0xda3   : > { %v2225_v28 = vpop.xlane.xlu0 %2224  ;;  %v1853_v29 = vpack.c.bf16 %v3517_v26, %v3515_v25  ;;  %v1850_v38 = vsel %vm763_vm2, %v3517_v26, 0.0  ;;  %3288 = vmatpush3.bf16.msra.mxu0 %v3443_v21  ;;  %v3444_v25 = vld [vmem:[%s4370_s5 + $0x30] sm:$0xff]  }
 0xda4   : > { %3522 = vpow2.f32 %v2099_v27  ;;  %v2227_v30 = vsub.f32 %v2216_v22, %v2225_v28  ;;  %3289 = vmatprep.subr.bf16.mxu0 %v3623_v44 }
 0xda5   : > { %3246 = vmatmul.mubr.msk.bf16.vlgmr.msra.gmra.mrb[32].mxu1 %vm763_vm2, %v1853_v29 }
 0xda6   : > { %v3519_v32 = vpop.eup %3518  ;;  %v2230_v33 = vmul.f32 1.442695, %v2227_v30  ;;  %3256 = vmatpush3.bf16.msra.mxu1 %v1978_v31  ;;  %3257 = vmatprep.mubr.msk.bf16.mxu1 %vm3624_vm1, %v3623_v44  ;;  %v3445_v31 = vld [vmem:[%s4370_s5 + $0x38] sm:$0xff]  }
 0xda7   : > { %v1969_v34 = vsel %vm763_vm2, %v3519_v32, 0.0  ;;  %3267 = vmatprep.subr.bf16.mxu1 %v3623_v44  ;;  %v2109_v42 = vpop.permute.xlu0 %2108  ;;  %3290 = vmatpush3.bf16.msra.mxu0 %v3444_v25 }
 0xda8   : > { %3524 = vpow2.f32 %v2230_v33  ;;  %1970 = vadd.xlane.f32.xlu1 %v1969_v34  ;;  %3291 = vmatprep.subr.bf16.mxu0 %v3623_v44 }
 0xdaa   : > { %v3521_v35 = vpop.eup %3520 }
 0xdab   : > { %v1972_v36 = vsel %vm763_vm2, %v3521_v35, 0.0  ;;  %v1975_v41 = vpack.c.bf16 %v3521_v35, %v3519_v32  ;;  %3292 = vmatpush3.bf16.msra.mxu0 %v3445_v31  ;;  %v3452_v31 = vld [vmem:[%s4376_s11 + $0x50] sm:$0xff]  }
 0xdac   : > { %1973 = vadd.xlane.f32.xlu0 %v1972_v36  ;;  %3309 = vmatprep.subr.bf16.mxu0 %v3623_v44 }
 0xdad   : > { %3258 = vmatmul.mubr.msk.bf16.vlgmr.msra.gmra.mrb[36].mxu1 %vm763_vm2, %v1975_v41 }
 0xdae   : > { %v3523_v45 = vpop.eup %3522  ;;  %3268 = vmatpush3.bf16.msra.mxu1 %v2109_v42  ;;  %3269 = vmatprep.mubr.msk.bf16.mxu1 %vm3624_vm1, %v3623_v44 }
 0xdaf   : > { %v2104_v39 = vsel %vm763_vm2, %v3523_v45, 0.0  ;;  %3279 = vmatprep.subr.bf16.mxu1 %v3623_v44 }
 0xdb0   : > { %2105 = vadd.xlane.f32.xlu1 %v2104_v39 }
 0xdb2   : > { %v3525_v40 = vpop.eup %3524 }
 0xdb3   : > { %v2235_v37 = vsel %vm763_vm2, %v3525_v40, 0.0 }
 0xdb4   : > { %2236 = vadd.xlane.f32.xlu1 %v2235_v37 }
 0xdb8   : > { %1851 = vadd.xlane.f32.xlu1 %v1850_v38 }
 0xdc6   : > { %v2091_v43 = vpop.xlane.xlu1 %2090 }
 0xdc7   : > { %v2095_v46 = vsub.f32 %v4119_v60, %v2091_v43 }
 0xdc9   : > { %v2097_v47 = vmul.f32 1.442695, %v2095_v46 }
 0xdca   : > { %v2222_v48 = vpop.xlane.xlu1 %2221 }
 0xdcb   : > { %3526 = vpow2.f32 %v2097_v47  ;;  %v2226_v49 = vsub.f32 %v4123_v2, %v2222_v48 }
 0xdcd   : > { %v2228_v50 = vmul.f32 1.442695, %v2226_v49 }
 0xdce   : > { %v2240_v54 = vpop.permute.xlu1 %2239 }
 0xdcf   : > { %3528 = vpow2.f32 %v2228_v50 }
 0xdd5   : > { %v3527_v51 = vpop.eup %3526 }
 0xdd6   : > { %v2101_v52 = vsel %vm763_vm2, %v3527_v51, 0.0  ;;  %v2107_v53 = vpack.c.bf16 %v3523_v45, %v3527_v51  ;;  %v2996_v51 = vld [vmem:[%s4371_s6 + $0x1] ss:$0 sm:$0xff] }
 0xdd7   : > { %2102 = vadd.xlane.f32.xlu0 %v2101_v52 }
 0xdd8   : > { %3270 = vmatmul.mubr.msk.bf16.vlgmr.msra.gmra.mrb[40].mxu1 %vm763_vm2, %v2107_v53 }
 0xdd9   : > { %v3529_v55 = vpop.eup %3528  ;;  %3280 = vmatpush3.bf16.msra.mxu1 %v2240_v54  ;;  %3281 = vmatprep.mubr.msk.bf16.mxu1 %vm3624_vm1, %v3623_v44 }
 0xdda   : > { %v2232_v56 = vsel %vm763_vm2, %v3529_v55, 0.0  ;;  %v2238_v57 = vpack.c.bf16 %v3525_v40, %v3529_v55  ;;  %3297 = vmatprep.subr.bf16.mxu1 %v3623_v44 }
 0xddb   : > { %2233 = vadd.xlane.f32.xlu0 %v2232_v56 }
 0xddf   : > { %1848 = vadd.xlane.f32.xlu0 %v1847_v58 }
 0xde0   : > { %3282 = vmatmul.mubr.msk.bf16.vlgmr.msra.gmra.mrb[44].mxu1 %vm763_vm2, %v2238_v57 }
 0xde1   : > { %3305 = vmatprep.mubr.msk.bf16.mxu1 %vm3624_vm1, %v3623_v44 }
 0xe35   : > { %v1971_v59 = vpop.xlane.xlu1 %1970 }
 0xe39   : > { %v1974_v60 = vpop.xlane.xlu0 %1973 }
 0xe3d   : > { %v2106_v61 = vpop.xlane.xlu1 %2105 }
 0xe41   : > { %v2237_v63 = vpop.xlane.xlu1 %2236 }
 0xe45   : > { %v1852_v2 = vpop.xlane.xlu1 %1851 }
 0xe64   : > { %v2103_v62 = vpop.xlane.xlu0 %2102 }
 0xe68   : > { %v2234_v0 = vpop.xlane.xlu0 %2233 }
 0xe6c   : > { %v1849_v1 = vpop.xlane.xlu0 %1848 }
 0xe6d   : > { %3530 = vrcp.f32 %v1849_v1 }
 0xe6e   : > { %3532 = vrcp.f32 %v1852_v2 }
 0xe6f   : > { %3534 = vrcp.f32 %v1971_v59 }
 0xe70   : > { %3536 = vrcp.f32 %v1974_v60 }
 0xe71   : > { %3538 = vrcp.f32 %v2103_v62 }
 0xe72   : > { %3540 = vrcp.f32 %v2106_v61 }
 0xe73   : > { %3542 = vrcp.f32 %v2234_v0 }
 0xe74   : > { %3544 = vrcp.f32 %v2237_v63 }
 0xe77   : > { %v3531_v3 = vpop.eup %3530 }
 0xe78   : > { %v1892_v22 = vpop.f32.mrb[32].mxu1  ;;  %v3533_v6 = vpop.eup %3532 }
 0xe79   : > { %v1901_v4 = vmul.f32 %v3531_v3, %v1892_v22  ;;  %v3247_v5 = vpop.f32.mrb[33].mxu1  ;;  %v3535_v10 = vpop.eup %3534 }
 0xe7a   : > { %v1895_v7 = vpop.f32.mrb[34].mxu1  ;;  %v3537_v14 = vpop.eup %3536 }
 0xe7b   : > { %1903 = vst.msk [vmem:[#allocation2] sm:$0xff] %vm763_vm2, %v1901_v4  ;;  %v1902_v8 = vmul.f32 %v3533_v6, %v1895_v7  ;;  %v3248_v9 = vpop.f32.mrb[35].mxu1  ;;  %v3539_v23 = vpop.eup %3538  ;;  %v3447_v6 = vld [vmem:[%s4374_s9 + $0x28] sm:$0xff]   ;;  %v3448_v7 = vld [vmem:[%s4374_s9 + $0x30] sm:$0xff]  }
 0xe7c   : > { %v3541_v30 = vpop.eup %3540 }
 0xe7d   : > { %1904 = vst.msk [vmem:[#allocation2 + $0x8] sm:$0xff] %vm763_vm2, %v1902_v8  ;;  %v3543_v33 = vpop.eup %3542  ;;  %v3449_v8 = vld [vmem:[%s4374_s9 + $0x38] sm:$0xff]  }
 0xe7e   : > { %v3545_v41 = vpop.eup %3544 }
 0xe80   : > { %v2017_v11 = vpop.f32.mrb[36].mxu1 }
 0xe81   : > { %v2026_v12 = vmul.f32 %v3535_v10, %v2017_v11  ;;  %v3259_v13 = vpop.f32.mrb[37].mxu1 }
 0xe82   : > { %v2020_v15 = vpop.f32.mrb[38].mxu1 }
 0xe83   : > { %v2027_v16 = vmul.f32 %v3537_v14, %v2020_v15  ;;  %2030 = vrot.lane.b32.xlu0 %v2026_v12, %s4425_s20  ;;  %v3260_v19 = vpop.f32.mrb[39].mxu1 }
 0xe84   : > { %v3004_v19 = vld [vmem:[%s4372_s7 + $0x1] ss:$0 sm:$0xff] }
 0xe85   : > { %2032 = vrot.lane.b32.xlu1 %v2027_v16, %s4425_s20  ;;  %s3061_s20 = sshll.u32 %s3754_s1, 4  ;;  %s2844_s1 = scalar_lea.sflag [#allocation4], %s593_s2 }
 0xe86   : > { %s4323_s23 = scalar_lea.hbm %s4384_s19, %s3061_s20 }
 0xeab   : > { %v2148_v24 = vpop.f32.mrb[40].mxu1 }
 0xeac   : > { %v2157_v26 = vmul.f32 %v3539_v23, %v2148_v24  ;;  %v3271_v27 = vpop.f32.mrb[41].mxu1  ;;  %v3005_v24 = vld [vmem:[%s4373_s8 + $0x1] ss:$0 sm:$0xff] }
 0xead   : > { %v2151_v28 = vpop.f32.mrb[42].mxu1 }
 0xeae   : > { %2161 = vrot.lane.b32.xlu1 %v2157_v26, %s4424_s24  ;;  %v3272_v29 = vpop.f32.mrb[43].mxu1  ;;  %v2158_v32 = vmul.f32 %v3541_v30, %v2151_v28  ;;  %v3451_v30 = vld [vmem:[%s4376_s11 + $0x48] sm:$0xff]  }
 0xeaf   : > { %v3450_v29 = vld [vmem:[%s4376_s11 + $0x40] sm:$0xff]  }
 0xeb2   : > { %2163 = vrot.lane.b32.xlu1 %v2158_v32, %s4424_s24  ;;  %v3453_v32 = vld [vmem:[%s4376_s11 + $0x58] sm:$0xff]  }
 0xeb3   : > { %v2279_v34 = vpop.f32.mrb[44].mxu1 }
 0xeb4   : > { %v2288_v35 = vmul.f32 %v3543_v33, %v2279_v34  ;;  %v3283_v36 = vpop.f32.mrb[45].mxu1  ;;  %v3454_v33 = vld [vmem:[%s4376_s11 + $0x60] sm:$0xff]   ;;  %v3455_v34 = vld [vmem:[%s4376_s11 + $0x68] sm:$0xff]  }
 0xeb5   : > { %v2282_v42 = vpop.f32.mrb[46].mxu1  ;;  %v3457_v36 = vld [vmem:[%s4376_s11 + $0x78] sm:$0xff]  }
 0xeb6   : > { %v2289_v45 = vmul.f32 %v3545_v41, %v2282_v42  ;;  %2292 = vrot.lane.b32.xlu0 %v2288_v35, %s4419_s0  ;;  %v3284_v39 = vpop.f32.mrb[47].mxu1  ;;  %v3456_v35 = vld [vmem:[%s4376_s11 + $0x70] sm:$0xff]   ;;  %v3015_v41 = vld [vmem:[%s4375_s10 + $0x1] ss:$0 sm:$0xff] }
 0xeb8   : > { %2294 = vrot.lane.b32.xlu1 %v2289_v45, %s4419_s0  ;;  %s594_s0 = scalar_lea.vmem [#allocation3], %s593_s2 }
 0xeb9   : > { %s2856_s24 = sshll.u32 %s594_s0, 4  ;;  %s4325_s24 = int_to_ptr.vmem [resolvable:$true] %s2856_s24 }
 0xeba   : > { %s3558_s26 = scalar_lea.vmem %s4325_s24, 16  ;;  %p3565_p0 = scmp.lt.s32.totalorder %s4325_s24, %s3563_s25 }
 0xebb   : > { %p3559_p11 = scmp.ne.s32.totalorder %s4325_s24, %s3558_s26  ;;  %p3566_p1 = scmp.lt.s32.totalorder %s3564_s27, %s3558_s26 }
 0xebd   : > { %p3560_p12 = pnand %p3559_p11, %p3771_p5  ;;  %p3567_p2 = por %p3566_p1, %p3565_p0 }
 0xebf   : > { %p3561_p13 = pneg %p3560_p12 }
 0xec1   : > { %p3568_p3 = pnand %p3567_p2, %p3561_p13 }
 0xef5   : > { %v2031_v40 = vpop.permute.xlu0 %2030 }
 0xef6   : > { %2036 = vst.msk [vmem:[#allocation2] sm:$0xff] %vm1012_vm3, %v2031_v40 }
 0xef7   : > { %v2033_v37 = vpop.permute.xlu1 %2032 }
 0xef8   : > { %2037 = vst.msk [vmem:[#allocation2 + $0x8] sm:$0xff] %vm1012_vm3, %v2033_v37 }
 0xf20   : > { %v2162_v38 = vpop.permute.xlu1 %2161 }
 0xf21   : > { %2167 = vst.msk [vmem:[#allocation2] sm:$0xff] %vm1144_vm4, %v2162_v38 }
 0xf24   : > { %v2164_v43 = vpop.permute.xlu1 %2163 }
 0xf25   : > { %2168 = vst.msk [vmem:[#allocation2 + $0x8] sm:$0xff] %vm1144_vm4, %v2164_v43 }
 0xf28   : > { %v2293_v46 = vpop.permute.xlu0 %2292 }
 0xf29   : > { %2298 = vst.msk [vmem:[#allocation2] sm:$0xff] %vm1276_vm5, %v2293_v46 }
 0xf2a   : > { %v2295_v47 = vpop.permute.xlu1 %2294 }
 0xf2b   : > { %2299 = vst.msk [vmem:[#allocation2 + $0x8] sm:$0xff] %vm1276_vm5, %v2295_v47 }
 0xf30   : > { %v2300_v48 = vld [vmem:[#allocation2] sm:$0xff] }
 0xf32   : > { %v2301_v49 = vld [vmem:[#allocation2 + $0x8] sm:$0xff] }
 0xf33   : > { %v2302_v50 = vpack.c.bf16 %v2301_v49, %v2300_v48 }
 0xf35   : > { %3294 = vmatmul.mubr.msk.bf16.vlgmr.msra.gmra.mrb[36].mxu0 %vm605_vm0, %v2302_v50 }
 0xf36   : > { %3325 = vmatprep.mubr.msk.bf16.mxu0 %vm3624_vm1, %v3623_v44  ;;  %3310 = vmatpush3.bf16.msra.mxu0 %v3450_v29  ;;  %v3464_v29 = vld [vmem:[%s4382_s17 + $0x10] sm:$0xff]  }
 0xf37   : > { %3311 = vmatprep.subr.bf16.mxu0 %v3623_v44 }
 0xf3a   : > { %3312 = vmatpush3.bf16.msra.mxu0 %v3451_v30  ;;  %v3465_v30 = vld [vmem:[%s4382_s17 + $0x18] sm:$0xff]  }
 0xf3b   : > { %3313 = vmatprep.subr.bf16.mxu0 %v3623_v44 }
 0xf3e   : > { %3314 = vmatpush3.bf16.msra.mxu0 %v3452_v31  ;;  %v2695_v31 = vld [vmem:[%s4381_s16] sm:$0x1] }
 0xf3f   : > { %3315 = vmatprep.subr.bf16.mxu0 %v3623_v44 }
 0xf42   : > { %3316 = vmatpush3.bf16.msra.mxu0 %v3453_v32 }
 0xf43   : > { %3317 = vmatprep.subr.bf16.mxu0 %v3623_v44 }
 0xf46   : > { %3318 = vmatpush3.bf16.msra.mxu0 %v3454_v33 }
 0xf47   : > { %3319 = vmatprep.subr.bf16.mxu0 %v3623_v44 }
 0xf4a   : > { %3320 = vmatpush3.bf16.msra.mxu0 %v3455_v34 }
 0xf4b   : > { %3321 = vmatprep.subr.bf16.mxu0 %v3623_v44 }
 0xf4e   : > { %3322 = vmatpush3.bf16.msra.mxu0 %v3456_v35 }
 0xf4f   : > { %3323 = vmatprep.subr.bf16.mxu0 %v3623_v44 }
 0xf52   : > { %3324 = vmatpush3.bf16.msra.mxu0 %v3457_v36 }
0x1008   : > { %v2381_v52 = vpop.f32.mrb[36].mxu0 }
0x1009   : > { %v2382_v53 = vadd.f32 %v2996_v51, %v2381_v52  ;;  %v3295_v54 = vpop.f32.mrb[37].mxu0 }
0x100a   : > { %v2384_v55 = vpop.f32.mrb[38].mxu0 }
0x100b   : > { %v2385_v56 = vadd.f32 %v2996_v51, %v2384_v55  ;;  %v3296_v57 = vpop.f32.mrb[39].mxu0  ;;  %v2388_v58 = vadd.f32 %v2382_v53, %v4069_v17 }
0x100d   : > { %v2394_v59 = vsel %vm605_vm0, %v2388_v58, 0.0  ;;  %v2389_v60 = vadd.f32 %v2385_v56, %v4071_v18  ;;  %v3446_v18 = vld [vmem:[%s4374_s9 + $0x20] sm:$0xff]  }
0x100e   : > { %2395 = vadd.xlane.f32.xlu0 %v2394_v59  ;;  %3298 = vmatpush3.bf16.msra.mxu1 %v3446_v18 }
0x100f   : > { %v2397_v61 = vsel %vm605_vm0, %v2389_v60, 0.0  ;;  %3299 = vmatprep.subr.bf16.mxu1 %v3623_v44 }
0x1010   : > { %2398 = vadd.xlane.f32.xlu1 %v2397_v61 }
0x1012   : > { %3300 = vmatpush3.bf16.msra.mxu1 %v3447_v6 }
0x1013   : > { %3301 = vmatprep.subr.bf16.mxu1 %v3623_v44 }
0x1016   : > { %3302 = vmatpush3.bf16.msra.mxu1 %v3448_v7 }
0x1017   : > { %3303 = vmatprep.subr.bf16.mxu1 %v3623_v44 }
0x101a   : > { %3304 = vmatpush3.bf16.msra.mxu1 %v3449_v8 }
0x101b   : > { %3329 = vmatprep.subr.bf16.mxu1 %v3623_v44 }
0x109b   : > { %v2396_v62 = vpop.xlane.xlu0 %2395 }
0x109c   : > { %v2400_v63 = vmul.f32 0.015625, %v2396_v62 }
0x109d   : > { %v2399_v0 = vpop.xlane.xlu1 %2398 }
0x109e   : > { %v2402_v1 = vsub.f32 %v2388_v58, %v2400_v63  ;;  %v2401_v2 = vmul.f32 0.015625, %v2399_v0  ;;  %v3038_v0 = vld [vmem:[%s4377_s12 + $0x1] ss:$0 sm:$0xff] }
0x10a0   : > { %v2403_v3 = vsub.f32 %v2389_v60, %v2401_v2  ;;  %v2404_v22 = vmul.f32 %v2402_v1, %v2402_v1 }
0x10a2   : > { %v2406_v4 = vsel %vm605_vm0, %v2404_v22, 0.0  ;;  %v2405_v5 = vmul.f32 %v2403_v3, %v2403_v3 }
0x10a3   : > { %2407 = vadd.xlane.f32.xlu0 %v2406_v4 }
0x10a4   : > { %v2409_v17 = vsel %vm605_vm0, %v2405_v5, 0.0 }
0x10a7   : > { %2410 = vadd.xlane.f32.xlu0 %v2409_v17 }
0x1130   : > { %v2408_v9 = vpop.xlane.xlu0 %2407 }
0x1131   : > { %v2412_v10 = vmul.f32 0.015625, %v2408_v9 }
0x1133   : > { %v2414_v11 = vadd.f32 1e-12, %v2412_v10  ;;  %v3458_v10 = vld [vmem:[%s4380_s15] sm:$0xff]  }
0x1134   : > { %v2411_v12 = vpop.xlane.xlu0 %2410 }
0x1135   : > { %3546 = vrsqrt.f32 %v2414_v11  ;;  %v2413_v13 = vmul.f32 0.015625, %v2411_v12  ;;  %v3459_v11 = vld [vmem:[%s4380_s15 + $0x8] sm:$0xff]   ;;  %v3460_v12 = vld [vmem:[%s4380_s15 + $0x10] sm:$0xff]  }
0x1137   : > { %v2415_v14 = vadd.f32 1e-12, %v2413_v13  ;;  %v3461_v13 = vld [vmem:[%s4380_s15 + $0x18] sm:$0xff]  }
0x1139   : > { %3548 = vrsqrt.f32 %v2415_v14 }
0x113f   : > { %v3547_v15 = vpop.eup %3546 }
0x1140   : > { %v2418_v16 = vmul.f32 %v3547_v15, %v2402_v1 }
0x1142   : > { %v2426_v21 = vmul.f32 %v3004_v19, %v2418_v16 }
0x1143   : > { %v3549_v20 = vpop.eup %3548 }
0x1144   : > { %v2419_v23 = vmul.f32 %v3549_v20, %v2403_v3  ;;  %v4225_v26 = vadd.f32 %v3005_v24, %v2426_v21  ;;  %v3049_v20 = vld [vmem:[%s4378_s13 + $0x1] ss:$0 sm:$0xff] }
0x1146   : > { %v2427_v25 = vmul.f32 %v3004_v19, %v2419_v23  ;;  %v3050_v23 = vld [vmem:[%s4379_s14 + $0x1] ss:$0 sm:$0xff] }
0x1148   : > { %v2435_v27 = vadd.f32 %v3005_v24, %v2427_v25 }
0x114a   : > { %v2436_v28 = vpack.c.bf16 %v2435_v27, %v4225_v26  ;;  %v3462_v27 = vld [vmem:[%s4382_s17] sm:$0xff]  }
0x114c   : > { %3306 = vmatmul.mubr.msk.bf16.vlgmr.msra.gmra.mrb[48].mxu1 %vm605_vm0, %v2436_v28  ;;  %v3463_v28 = vld [vmem:[%s4382_s17 + $0x8] sm:$0xff]  }
0x114d   : > { %3337 = vmatprep.mubr.msk.bf16.mxu1 %vm3624_vm1, %v3623_v44  ;;  %3330 = vmatpush3.bf16.msra.mxu1 %v3458_v10 }
0x114e   : > { %3331 = vmatprep.subr.bf16.mxu1 %v3623_v44 }
0x1151   : > { %3332 = vmatpush3.bf16.msra.mxu1 %v3459_v11 }
0x1152   : > { %3333 = vmatprep.subr.bf16.mxu1 %v3623_v44 }
0x1155   : > { %3334 = vmatpush3.bf16.msra.mxu1 %v3460_v12 }
0x1156   : > { %3335 = vmatprep.subr.bf16.mxu1 %v3623_v44 }
0x1159   : > { %3336 = vmatpush3.bf16.msra.mxu1 %v3461_v13 }
0x115a   : > { %3341 = vmatprep.subr.bf16.mxu1 %v3623_v44 }
0x121f   : > { %v2515_v42 = vpop.f32.mrb[48].mxu1 }
0x1220   : > { %v2516_v45 = vadd.f32 %v3015_v41, %v2515_v42  ;;  %v3307_v39 = vpop.f32.mrb[49].mxu1 }
0x1221   : > { %v2518_v40 = vpop.f32.mrb[50].mxu1 }
0x1222   : > { %v2524_v37 = vmul.f32 0.044715, %v2516_v45  ;;  %v2519_v38 = vadd.f32 %v3015_v41, %v2518_v40  ;;  %v3308_v43 = vpop.f32.mrb[51].mxu1  ;;  %v2522_v58 = vmul.f32 0.5, %v2516_v45 }
0x1224   : > { %v2526_v46 = vmul.f32 %v2524_v37, %v2516_v45  ;;  %v2525_v47 = vmul.f32 0.044715, %v2519_v38  ;;  %v2523_v59 = vmul.f32 0.5, %v2519_v38 }
0x1226   : > { %v2528_v48 = vmul.f32 %v2526_v46, %v2516_v45  ;;  %v2527_v49 = vmul.f32 %v2525_v47, %v2519_v38 }
0x1228   : > { %v2530_v50 = vadd.f32 %v2528_v48, %v2516_v45  ;;  %v2529_v51 = vmul.f32 %v2527_v49, %v2519_v38 }
0x122a   : > { %v2532_v52 = vmul.f32 0.7978846, %v2530_v50  ;;  %v2531_v53 = vadd.f32 %v2529_v51, %v2519_v38 }
0x122c   : > { %3550 = vtanh.f32 %v2532_v52  ;;  %v2533_v54 = vmul.f32 0.7978846, %v2531_v53 }
0x122e   : > { %3552 = vtanh.f32 %v2533_v54 }
0x1236   : > { %v3551_v55 = vpop.eup %3550 }
0x1237   : > { %v2536_v56 = vadd.f32 1.0, %v3551_v55 }
0x1238   : > { %v3553_v57 = vpop.eup %3552 }
0x1239   : > { %v2537_v60 = vadd.f32 1.0, %v3553_v57  ;;  %v2538_v61 = vmul.f32 %v2536_v56, %v2522_v58 }
0x123b   : > { %v2539_v62 = vmul.f32 %v2537_v60, %v2523_v59 }
0x123d   : > { %v2540_v63 = vpack.c.bf16 %v2539_v62, %v2538_v61 }
0x123f   : > { %3326 = vmatmul.mubr.bf16.vlgmr.msra.gmra.mrb[40].mxu0 %v2540_v63 }
0x1312   : > { %v2648_v1 = vpop.f32.mrb[40].mxu0 }
0x1313   : > { %v2649_v2 = vadd.f32 %v3038_v0, %v2648_v1  ;;  %v3327_v3 = vpop.f32.mrb[41].mxu0 }
0x1314   : > { %v2651_v22 = vpop.f32.mrb[42].mxu0 }
0x1315   : > { %v3328_v4 = vpop.f32.mrb[43].mxu0  ;;  %v2654_v5 = vadd.f32 %v2649_v2, %v4225_v26 }
0x1317   : > { %v2659_v17 = vsel %vm605_vm0, %v2654_v5, 0.0 }
0x1318   : > { %2660 = vadd.xlane.f32.xlu0 %v2659_v17 }
0x13a5   : > { %v2661_v18 = vpop.xlane.xlu0 %2660 }
0x13a6   : > { %v2662_v6 = vmul.f32 0.015625, %v2661_v18 }
0x13a8   : > { %v2663_v7 = vsub.f32 %v2654_v5, %v2662_v6 }
0x13aa   : > { %v2664_v8 = vmul.f32 %v2663_v7, %v2663_v7 }
0x13ac   : > { %v2665_v9 = vsel %vm605_vm0, %v2664_v8, 0.0 }
0x13ad   : > { %2666 = vadd.xlane.f32.xlu1 %v2665_v9 }
0x143a   : > { %v2667_v14 = vpop.xlane.xlu1 %2666 }
0x143b   : > { %v2668_v15 = vmul.f32 0.015625, %v2667_v14 }
0x143d   : > { %v2669_v16 = vadd.f32 1e-12, %v2668_v15 }
0x143f   : > { %3554 = vrsqrt.f32 %v2669_v16 }
0x1449   : > { %v3555_v19 = vpop.eup %3554 }
0x144a   : > { %v2671_v21 = vmul.f32 %v3555_v19, %v2663_v7 }
0x144c   : > { %v2678_v24 = vmul.f32 %v3049_v20, %v2671_v21 }
0x144e   : > { %v2685_v25 = vadd.f32 %v3050_v23, %v2678_v24 }
0x1450   : > { %v2686_v26 = vpack.c.bf16 %v2685_v25, %v2685_v25 }
0x1452   : > { %3338 = vmatmul.mubr.msk.bf16.vlgmr.msra.gmra.mrb[52].mxu1 %vm605_vm0, %v2686_v26 }
0x1453   : > { %3349 = vmatprep.mubr.msk.bf16.mxu1 %vm3624_vm1, %v3623_v44  ;;  %3342 = vmatpush3.bf16.msra.mxu1 %v3462_v27 }
0x1454   : > { %3343 = vmatprep.subr.bf16.mxu1 %v3623_v44 }
0x1457   : > { %3344 = vmatpush3.bf16.msra.mxu1 %v3463_v28 }
0x1458   : > { %3345 = vmatprep.subr.bf16.mxu1 %v3623_v44 }
0x145b   : > { %3346 = vmatpush3.bf16.msra.mxu1 %v3464_v29 }
0x145c   : > { %3347 = vmatprep.subr.bf16.mxu1 %v3623_v44  ;;  %v2773_v44 = vld [vmem:[%s4383_s18] sm:$0x1] }
0x145f   : > { %3348 = vmatpush3.bf16.msra.mxu1 %v3465_v30 }
0x1525   : > { %v2757_v32 = vpop.f32.mrb[52].mxu1 }
0x1526   : > { %v2758_v33 = vadd.f32 %v2757_v32, %v2695_v31  ;;  %v3339_v34 = vpop.f32.mrb[53].mxu1 }
0x1527   : > { %v2760_v35 = vpop.f32.mrb[54].mxu1 }
0x1528   : > { %3556 = vtanh.f32 %v2758_v33  ;;  %v3340_v36 = vpop.f32.mrb[55].mxu1 }
0x1532   : > { %v3557_v41 = vpop.eup %3556 }
0x1533   : > { %v2764_v42 = vpack.c.bf16 %v3557_v41, %v3557_v41 }
0x1535   : > { %3350 = vmatmul.mubr.msk.bf16.vlgmr.msra.gmra.mrb[56].mxu1 %vm605_vm0, %v2764_v42 }
0x1608   : > { %v2835_v45 = vpop.f32.mrb[56].mxu1 }
0x1609   : > { %v2836_v39 = vadd.f32 %v2835_v45, %v2773_v44  ;;  %v3351_v40 = vpop.f32.mrb[57].mxu1 }
0x160a   : > { %v2838_v37 = vpop.f32.mrb[58].mxu1 }
0x160b   : > { %v3352_v38 = vpop.f32.mrb[59].mxu1  ;;  %2842 = vst.msk [vmem:[%s594_s0] sm:$0x1] %vm2841_vm6, %v2836_v39 }
0x160c   : > { %3571 = shalt.err (!%p3568_p3)
}
0x160d   : > { %s3572_s2 = scalar_lea.hbm %s4323_s23, 16  ;;  %s3576_s22 = scalar_lea.hbm %s4384_s19, 32 }
0x160e   : > { %p3573_p4 = scmp.ne.s32.totalorder %s4323_s23, %s3572_s2  ;;  %p3577_p9 = scmp.lt.u32.totalorder %s4323_s23, %s4384_s19 }
0x160f   : > { %p3578_p10 = scmp.lt.u32.totalorder %s3576_s22, %s3572_s2  ;;  %p3580_p12 = scmp.lt.u32.totalorder %s3572_s2, %s4323_s23 }
0x1610   : > { %p3574_p7 = pnand %p3573_p4, %p3771_p5 }
0x1611   : > { %p3579_p11 = por %p3578_p10, %p3577_p9 }
0x1612   : > { %p3575_p8 = pneg %p3574_p7 }
0x1613   : > { %p3581_p13 = por %p3580_p12, %p3579_p11 }
0x1615   : > { %p3582_p0 = pnand %p3581_p13, %p3575_p8 }
0x1617   : > { %3585 = shalt.err (!%p3582_p0)
}
0x1618   : > { %3353 = dma.vmem_to_hbm [thread:$0]  (%p3771_p5), %s4325_s24, 16, %s4323_s23, %s2844_s1  }
0x1619 PF: > { %s4426_s26 = sld [smem:[#allocation6_spill]]  ;;  %p3359_p1 = scmp.ge.s32.totalorder %s3620_s21, 2 }
0x161b   : > { %p3356_p2 = pnand %p3359_p1, %p3775_p6 }
0x161f   : > { %s2868_s20 = sand.u32 1, %s4426_s26  }
0x1620   : > { %s2869_s0 = scalar_lea.sflag [#allocation4], %s2868_s20 }
0x1621   : > { %3603 = dma.done.wait (!%p3356_p2), %s2869_s0, 16  }
0x1622   : > { %3605 = vsyncadd (!%p3356_p2), %s2869_s0, 4294967280  ;;  %s4428_s21 = sld [smem:[#allocation8_spill]]  ;;  %s4429_s2 = sld [smem:[#allocation7_spill]] }
0x1623   : > { %s4430_s20 = sld [smem:[#allocation9_spill]]  ;;  %s4431_s0 = smov %s3612_s30 }
0x1628   : > { %p29_p3 = scmp.ge.s32.totalorder %s4428_s21, 4   ;;  %s4432_s30 = smov %s4429_s2 }
0x162a   :  { %31 = sbr.rel (!%p29_p3) target bundleno = 8 (0x8), region = 143 }
0x1631   :  { %2873 = vsyncpa [#allocation4], 1 }
0x1632   :  { %2875 = vsyncpa [#allocation4 + $0x1], 1 }

</bundles_post_ra>
